<compile_context>
chip_gen: v5e
topology: v5e:2x2
jax: 0.10.0
libtpu: 0.0.40
codegen_flags: <defaults>
</compile_context>

<pallas_src>
import functools
import math

import jax
import jax.numpy as jnp
from jax.experimental import pallas as pl
from jax.experimental.pallas import tpu as pltpu


_LANE = 128                       # TPU lane width: pad all minor dims to this
_VMEM_LIMIT = 32 * 1024 * 1024    # safe cap on v5e/v6e (128 MiB) and v7x (64 MiB)


def _round_up(v, m):
    return ((v + m - 1) // m) * m


def _pad2(x, rows, cols):
    return jnp.pad(x, ((0, rows - x.shape[0]), (0, cols - x.shape[1])))


# ----------------------------- kernels --------------------------------------


def fc_relu_kernel(x_ref, w_ref, b_ref, o_ref):
    # o = relu(x @ w + b); x/w are bf16 (MXU), accumulate + bias/relu in f32.
    z = jnp.dot(x_ref[...], w_ref[...], preferred_element_type=jnp.float32)
    o_ref[...] = jnp.maximum(z + b_ref[...], 0.0)


def gcn2_stack_kernel(ahat_ref, h0_ref, w_ref, b_ref, o_ref,
                      acc_ref, h_scr_ref, *, alpha, tm):
    """All GCN2Conv layers fused.  grid = (L, row_tiles, k_tiles).

    ahat_ref : (TM, TK)       bf16, streamed A_hat tile
    h0_ref   : (N_pad, HID_P) f32,  full-array VMEM resident (block idx fixed)
    w_ref    : (HID_P, HID_P) bf16, W_eff of current layer
    b_ref    : (1, HID_P)     f32,  bias of current layer
    o_ref    : (TM, HID_P)    bf16, final-layer activations
    acc_ref  : VMEM (TM, HID_P) f32 accumulator for A_hat @ h
    h_scr_ref: VMEM (2*row_tiles, TM, HID_P) bf16, double-buffered resident h:
               slot l%2 is read, slot (l+1)%2 is written, so row tiles of the
               new layer never clobber h still needed by other row tiles.
    """
    l = pl.program_id(0)
    i = pl.program_id(1)
    k = pl.program_id(2)
    num_l = pl.num_programs(0)
    num_k = pl.num_programs(2)
    n_row = h_scr_ref.shape[0] // 2   # row tiles; slot s occupies [s*n_row, ...)

    # Seed the resident h buffer (slot 0) from h0 on the very first grid step.
    @pl.when((l == 0) & (i == 0) & (k == 0))
    def _seed():
        for blk in range(n_row):                        # static unroll
            h_scr_ref[blk] = h0_ref[pl.ds(blk * tm, tm), :].astype(
                h_scr_ref.dtype)

    # Accumulator init at the start of the k reduction of this (layer, row).
    @pl.when(k == 0)
    def _init():
        acc_ref[...] = jnp.zeros_like(acc_ref)

    # Propagation: acc += A_hat[i, k] @ h_prev[k]   (MXU, bf16 in / f32 acc)
    read_base = (l % 2) * n_row
    acc_ref[...] += jnp.dot(ahat_ref[...], h_scr_ref[read_base + k],
                            preferred_element_type=jnp.float32)

    # Finalize this row tile once the k reduction is complete.
    @pl.when(k == num_k - 1)
    def _finish():
        row0 = pl.multiple_of(i * tm, tm)
        h0_tile = h0_ref[pl.ds(row0, tm), :]            # f32 initial residual
        support = (1.0 - alpha) * acc_ref[...] + alpha * h0_tile
        # identity mapping (1-beta)I + beta*W already folded into w_ref
        z = jnp.dot(support.astype(w_ref.dtype), w_ref[...],
                    preferred_element_type=jnp.float32)
        new_h = jnp.maximum(z + b_ref[...], 0.0)
        new_h_bf = new_h.astype(h_scr_ref.dtype)
        write_base = ((l + 1) % 2) * n_row
        h_scr_ref[write_base + i] = new_h_bf

        @pl.when(l == num_l - 1)
        def _emit():
            o_ref[...] = new_h_bf


def fc_logsoftmax_kernel(x_ref, w_ref, b_ref, o_ref, *, valid_out):
    # logits are lane-padded to a multiple of 128; padded lanes are masked to
    # -inf before the log-softmax reduction so the normalizer is exact.
    z = jnp.dot(x_ref[...], w_ref[...],
                preferred_element_type=jnp.float32) + b_ref[...]
    col = jax.lax.broadcasted_iota(jnp.int32, z.shape, 1)
    z = jnp.where(col < valid_out, z, -jnp.inf)
    m = jnp.max(z, axis=1, keepdims=True)
    lse = m + jnp.log(jnp.sum(jnp.exp(z - m), axis=1, keepdims=True))
    o_ref[...] = z - lse


# ----------------------------- wrappers -------------------------------------


def fc_relu(x, w, b, *, tm):
    n, f_in = x.shape
    f_out = w.shape[1]
    return pl.pallas_call(
        fc_relu_kernel,
        out_shape=jax.ShapeDtypeStruct((n, f_out), jnp.float32),
        grid=(n // tm,),
        in_specs=[
            pl.BlockSpec((tm, f_in), lambda i: (i, 0)),
            pl.BlockSpec((f_in, f_out), lambda i: (0, 0)),
            pl.BlockSpec((1, f_out), lambda i: (0, 0)),
        ],
        out_specs=pl.BlockSpec((tm, f_out), lambda i: (i, 0)),
        compiler_params=pltpu.CompilerParams(
            dimension_semantics=("parallel",),
            vmem_limit_bytes=_VMEM_LIMIT),
        cost_estimate=pl.CostEstimate(
            flops=2 * n * f_in * f_out, transcendentals=0,
            bytes_accessed=n * f_in * 2 + f_in * f_out * 2 + n * f_out * 4),
    )(x, w, b)


def gcn2_stack(ahat, h0, w_eff, bias, *, alpha, tm, tk):
    """One pallas_call for the whole GCN2Conv stack."""
    # TODO(synk): block-sparse A_hat streaming (scalar-prefetched nonzero tile
    #             list via PrefetchScalarGridSpec) for large sparse graphs.
    n_pad = ahat.shape[0]
    hid_p = h0.shape[1]
    layers = w_eff.shape[0]
    assert tm == tk, "resident h is blocked in TM rows, so TM must equal TK"
    n_row, n_k = n_pad // tm, n_pad // tk

    kern = functools.partial(gcn2_stack_kernel, alpha=alpha, tm=tm)
    grid_spec = pltpu.PrefetchScalarGridSpec(
        num_scalar_prefetch=0,
        grid=(layers, n_row, n_k),
        in_specs=[
            pl.BlockSpec((tm, tk), lambda l, i, k: (i, k)),            # A_hat
            pl.BlockSpec((n_pad, hid_p), lambda l, i, k: (0, 0)),      # h0
            pl.BlockSpec((None, hid_p, hid_p), lambda l, i, k: (l, 0, 0)),
            pl.BlockSpec((None, 1, hid_p), lambda l, i, k: (l, 0, 0)),
        ],
        out_specs=pl.BlockSpec((tm, hid_p), lambda l, i, k: (i, 0)),
        scratch_shapes=[
            pltpu.VMEM((tm, hid_p), jnp.float32),                      # acc
            pltpu.VMEM((2 * n_row, tm, hid_p), jnp.bfloat16),          # resident h
        ],
    )
    flops = layers * (2 * n_pad * n_pad * hid_p + 2 * n_pad * hid_p * hid_p)
    bytes_accessed = (layers * n_pad * n_pad * 2        # A_hat stream (bf16)
                      + n_pad * hid_p * 4               # h0 (f32, once)
                      + layers * hid_p * hid_p * 2      # W_eff
                      + layers * n_pad * hid_p * 2)     # output writebacks
    return pl.pallas_call(
        kern,
        grid_spec=grid_spec,
        out_shape=jax.ShapeDtypeStruct((n_pad, hid_p), jnp.bfloat16),
        # The layer axis AND the row axis carry the cross-layer dependency
        # through the VMEM-resident h, so both must stay sequential
        # ("arbitrary"); only an un-fused variant could shard rows on v7x's
        # second TensorCore.
        compiler_params=pltpu.CompilerParams(
            dimension_semantics=("arbitrary", "arbitrary", "arbitrary"),
            vmem_limit_bytes=_VMEM_LIMIT),
        cost_estimate=pl.CostEstimate(flops=flops, transcendentals=0,
                                      bytes_accessed=bytes_accessed),
    )(ahat, h0, w_eff, bias)


def fc_logsoftmax(x, w, b, *, valid_out, tm):
    n, f_in = x.shape
    f_out = w.shape[1]
    kern = functools.partial(fc_logsoftmax_kernel, valid_out=valid_out)
    return pl.pallas_call(
        kern,
        out_shape=jax.ShapeDtypeStruct((n, f_out), jnp.float32),
        grid=(n // tm,),
        in_specs=[
            pl.BlockSpec((tm, f_in), lambda i: (i, 0)),
            pl.BlockSpec((f_in, f_out), lambda i: (0, 0)),
            pl.BlockSpec((1, f_out), lambda i: (0, 0)),
        ],
        out_specs=pl.BlockSpec((tm, f_out), lambda i: (i, 0)),
        compiler_params=pltpu.CompilerParams(
            dimension_semantics=("parallel",),
            vmem_limit_bytes=_VMEM_LIMIT),
        cost_estimate=pl.CostEstimate(
            flops=2 * n * f_in * f_out, transcendentals=n * f_out,
            bytes_accessed=n * f_in * 2 + f_in * f_out * 2 + n * f_out * 4),
    )(x, w, b)


# ----------------------------- model ----------------------------------------


def init_params(key, in_size, hid_size, out_size, num_layers):
    ks = jax.random.split(key, 2 * num_layers + 4)
    params = {}
    params["w_in"] = jax.random.normal(ks[0], (in_size, hid_size), jnp.float32) * 0.1
    params["b_in"] = jax.random.normal(ks[1], (1, hid_size), jnp.float32) * 0.1
    params["conv"] = []
    for i in range(num_layers):
        w = jax.random.normal(ks[2 + 2 * i], (hid_size, hid_size), jnp.float32) * 0.1
        b = jax.random.normal(ks[3 + 2 * i], (1, hid_size), jnp.float32) * 0.01
        params["conv"].append((w, b))
    params["w_out"] = jax.random.normal(ks[-2], (hid_size, out_size), jnp.float32) * 0.1
    params["b_out"] = jax.random.normal(ks[-1], (1, out_size), jnp.float32) * 0.1
    return params


def gcnii_forward(ahat, features, params, *, alpha, lambda_, tm=128, tk=128):
    """End-to-end GCNII forward (inference).  Plain-JAX glue only pads, casts
    to bf16 for the MXU, and folds (1-beta)I + beta*W; all heavy math is
    Pallas."""
    n, in_size = features.shape
    hid = params["w_in"].shape[1]
    out_size = params["w_out"].shape[1]

    n_pad = _round_up(max(n, tm), tm)
    in_p = _round_up(max(in_size, _LANE), _LANE)
    hid_p = _round_up(max(hid, _LANE), _LANE)
    out_p = _round_up(max(out_size, _LANE), _LANE)

    # MXU operands in bf16; biases / residual stay f32 (v5e has no bf16 VPU).
    x_p = _pad2(features, n_pad, in_p).astype(jnp.bfloat16)
    ahat_p = _pad2(ahat, n_pad, n_pad).astype(jnp.bfloat16)
    w_in = _pad2(params["w_in"], in_p, hid_p).astype(jnp.bfloat16)
    b_in = _pad2(params["b_in"], 1, hid_p)

    eye = jnp.eye(hid_p, dtype=jnp.float32)
    w_eff, biases = [], []
    for idx, (w, b) in enumerate(params["conv"], start=1):
        beta = math.log(lambda_ / idx + 1.0)
        w_eff.append(((1.0 - beta) * eye + beta * _pad2(w, hid_p, hid_p))
                     .astype(jnp.bfloat16))
        biases.append(_pad2(b, 1, hid_p))
    w_eff = jnp.stack(w_eff)           # [L, hid_p, hid_p] bf16
    biases = jnp.stack(biases)         # [L, 1, hid_p]     f32

    w_out = _pad2(params["w_out"], hid_p, out_p).astype(jnp.bfloat16)
    b_out = _pad2(params["b_out"], 1, out_p)

    # F.dropout(..., training=False) == identity (inference mode).
    # TODO(synk): training-mode dropout (pltpu.prng_random_bits mask) not wired in.
    h0 = fc_relu(x_p, w_in, b_in, tm=tm)                               # f32
    h_fin = gcn2_stack(ahat_p, h0, w_eff, biases, alpha=alpha, tm=tm, tk=tk)
    logp = fc_logsoftmax(h_fin, w_out, b_out, valid_out=out_size, tm=tm)
    return logp[:n, :out_size]


# ----------------------------- reference & demo ------------------------------


def gcnii_reference(ahat, features, params, *, alpha, lambda_):
    """Pure-JAX reference using the same bf16-input / f32-accumulate recipe."""
    bf, f32 = jnp.bfloat16, jnp.float32
    mm = lambda a, b: jnp.dot(a.astype(bf), b.astype(bf),
                              preferred_element_type=f32)
    h = jnp.maximum(mm(features, params["w_in"]) + params["b_in"], 0.0)
    h0 = h
    hid = params["w_in"].shape[1]
    eye = jnp.eye(hid, dtype=f32)
    for idx, (w, b) in enumerate(params["conv"], start=1):
        beta = math.log(lambda_ / idx + 1.0)
        support = (1.0 - alpha) * mm(ahat, h) + alpha * h0
        w_eff = (1.0 - beta) * eye + beta * w
        h = jnp.maximum(mm(support, w_eff) + b, 0.0)
    z = mm(h, params["w_out"]) + params["b_out"]
    return jax.nn.log_softmax(z, axis=1)


def build_normalized_adjacency(key, n):
    # random symmetric graph + self-loops, symmetric normalization
    a = jax.random.bernoulli(key, 0.1, (n, n)).astype(jnp.float32)
    a = jnp.maximum(a, a.T)
    a = jnp.maximum(a, jnp.eye(n, dtype=jnp.float32))   # add self-loops
    deg = jnp.clip(jnp.sum(a, axis=1), 1.0, None)
    d_inv_sqrt = deg ** -0.5
    return d_inv_sqrt[:, None] * a * d_inv_sqrt[None, :]


if __name__ == "__main__":
    # small, deliberately not tile-aligned (exercises the padding paths)
    N, IN, HID, OUT, LAYERS = 200, 16, 32, 8, 4
    ALPHA, LAMBDA = 0.1, 0.5

    key = jax.random.PRNGKey(0)
    k_feat, k_graph, k_params = jax.random.split(key, 3)

    features = jax.random.normal(k_feat, (N, IN), jnp.float32)
    ahat = build_normalized_adjacency(k_graph, N)
    params = init_params(k_params, IN, HID, OUT, LAYERS)

    fwd = jax.jit(functools.partial(gcnii_forward, alpha=ALPHA, lambda_=LAMBDA))
    out = jax.block_until_ready(fwd(ahat, features, params))

    assert out.shape == (N, OUT)
    # log_softmax rows must exponentiate-sum to ~1
    assert bool(jnp.all(jnp.abs(jnp.sum(jnp.exp(out), axis=1) - 1.0) < 1e-4))
    # must match the pure-JAX reference
    ref = gcnii_reference(ahat, features, params, alpha=ALPHA, lambda_=LAMBDA)
    err = float(jnp.max(jnp.abs(out - ref)))
    assert err < 5e-2, f"mismatch vs reference: max abs err = {err}"
    print("KERNEL_OK")
</pallas_src>

<mosaic_0001>
module attributes {stable_mosaic.version = 11 : i64} {
  func.func @fc_relu_kernel(%arg0: i32, %arg1: memref<128x128xbf16, #tpu.memory_space<vmem>>, %arg2: memref<128x128xbf16, #tpu.memory_space<vmem>>, %arg3: memref<1x128xf32, #tpu.memory_space<vmem>>, %arg4: memref<128x128xf32, #tpu.memory_space<vmem>>) attributes {dimension_semantics = [#tpu.dimension_semantics<parallel>], iteration_bounds = array<i64: 2>, scalar_prefetch = 0 : i64, scratch_operands = 0 : i64, tpu.core_type = #tpu.core_type<tc>, window_params = [{transform_indices = @transform_0, window_bounds = array<i64: 128, 128>}, {pipeline_mode = #tpu.pipeline_mode<synchronous>, transform_indices = @transform_1, window_bounds = array<i64: 128, 128>}, {pipeline_mode = #tpu.pipeline_mode<synchronous>, transform_indices = @transform_2, window_bounds = array<i64: 1, 128>}, {transform_indices = @transform_3, window_bounds = array<i64: 128, 128>}]} {
    %c0 = arith.constant 0 : index
    %c0_0 = arith.constant 0 : index
    %0 = vector.load %arg1[%c0, %c0_0] : memref<128x128xbf16, #tpu.memory_space<vmem>>, vector<128x128xbf16>
    %c0_1 = arith.constant 0 : index
    %c0_2 = arith.constant 0 : index
    %1 = vector.load %arg2[%c0_1, %c0_2] : memref<128x128xbf16, #tpu.memory_space<vmem>>, vector<128x128xbf16>
    %cst = arith.constant dense<0.000000e+00> : vector<128x128xf32>
    %2 = tpu.matmul %0, %1, %cst {dimension_numbers = #tpu.dot_dimension_numbers<[1], [0], [0], [1], [0, 0, 1, 1], [], []>} : vector<128x128xbf16>, vector<128x128xbf16>, vector<128x128xf32> -> vector<128x128xf32>
    %c0_3 = arith.constant 0 : index
    %c0_4 = arith.constant 0 : index
    %3 = vector.load %arg3[%c0_3, %c0_4] : memref<1x128xf32, #tpu.memory_space<vmem>>, vector<1x128xf32>
    %4 = vector.broadcast %3 : vector<1x128xf32> to vector<128x128xf32>
    %5 = arith.addf %2, %4 : vector<128x128xf32>
    %cst_5 = arith.constant 0.000000e+00 : f32
    %6 = vector.broadcast %cst_5 : f32 to vector<128x128xf32>
    %7 = arith.maximumf %5, %6 : vector<128x128xf32>
    %c0_6 = arith.constant 0 : index
    %c0_7 = arith.constant 0 : index
    %8 = vector.load %arg4[%c0_6, %c0_7] : memref<128x128xf32, #tpu.memory_space<vmem>>, vector<128x128xf32>
    tpu.vector_store %arg4[%c0_6, %c0_7], %7 {strides = array<i32>} : memref<128x128xf32, #tpu.memory_space<vmem>>, vector<128x128xf32>,
    return
  }
  func.func @transform_0(%arg0: i32) -> (i32, i32) {
    %c0_i32 = arith.constant 0 : i32
    %c0_i32_0 = arith.constant 0 : i32
    return %arg0, %c0_i32 : i32, i32
  }
  func.func @transform_1(%arg0: i32) -> (i32, i32) {
    %c0_i32 = arith.constant 0 : i32
    %c0_i32_0 = arith.constant 0 : i32
    %c0_i32_1 = arith.constant 0 : i32
    return %c0_i32, %c0_i32_0 : i32, i32
  }
  func.func @transform_2(%arg0: i32) -> (i32, i32) {
    %c0_i32 = arith.constant 0 : i32
    %c0_i32_0 = arith.constant 0 : i32
    %c0_i32_1 = arith.constant 0 : i32
    return %c0_i32, %c0_i32_0 : i32, i32
  }
  func.func @transform_3(%arg0: i32) -> (i32, i32) {
    %c0_i32 = arith.constant 0 : i32
    %c0_i32_0 = arith.constant 0 : i32
    return %arg0, %c0_i32 : i32, i32
  }
}

module attributes {stable_mosaic.version = 11 : i64} {
  func.func @gcn2_stack_kernel(%arg0: i32, %arg1: i32, %arg2: i32, %arg3: memref<128x128xbf16, #tpu.memory_space<vmem>>, %arg4: memref<256x128xf32, #tpu.memory_space<vmem>>, %arg5: memref<1x128x128xbf16, #tpu.memory_space<vmem>>, %arg6: memref<1x1x128xf32, #tpu.memory_space<vmem>>, %arg7: memref<128x128xbf16, #tpu.memory_space<vmem>>, %arg8: memref<128x128xf32, #tpu.memory_space<vmem>>, %arg9: memref<4x128x128xbf16, #tpu.memory_space<vmem>>) attributes {dimension_semantics = [#tpu.dimension_semantics<arbitrary>, #tpu.dimension_semantics<arbitrary>, #tpu.dimension_semantics<arbitrary>], iteration_bounds = array<i64: 4, 2, 2>, scalar_prefetch = 0 : i64, scratch_operands = 2 : i64, tpu.core_type = #tpu.core_type<tc>, window_params = [{transform_indices = @transform_0, window_bounds = array<i64: 128, 128>}, {pipeline_mode = #tpu.pipeline_mode<synchronous>, transform_indices = @transform_1, window_bounds = array<i64: 256, 128>}, {transform_indices = @transform_2, window_bounds = array<i64: 1, 128, 128>}, {transform_indices = @transform_3, window_bounds = array<i64: 1, 1, 128>}, {transform_indices = @transform_4, window_bounds = array<i64: 128, 128>}]} {
    %c0_i32 = arith.constant 0 : i32
    %0 = arith.cmpi eq, %arg0, %c0_i32 : i32
    %c0_i32_0 = arith.constant 0 : i32
    %1 = arith.cmpi eq, %arg1, %c0_i32_0 : i32
    %2 = arith.andi %0, %1 : i1
    %c0_i32_1 = arith.constant 0 : i32
    %3 = arith.cmpi eq, %arg2, %c0_i32_1 : i32
    %4 = arith.andi %2, %3 : i1
    %5 = arith.extui %4 : i1 to i32
    %c0_i32_2 = arith.constant 0 : i32
    %6 = arith.cmpi ne, %5, %c0_i32_2 : i32
    scf.if %6 {
      %c0_19 = arith.constant 0 : index
      %c0_20 = arith.constant 0 : index
      %33 = vector.load %arg4[%c0_19, %c0_20] : memref<256x128xf32, #tpu.memory_space<vmem>>, vector<128x128xf32>
      %34 = arith.truncf %33 : vector<128x128xf32> to vector<128x128xbf16>
      %c0_21 = arith.constant 0 : index
      %c0_22 = arith.constant 0 : index
      %c0_23 = arith.constant 0 : index
      %35 = vector.load %arg9[%c0_21, %c0_22, %c0_23] : memref<4x128x128xbf16, #tpu.memory_space<vmem>>, vector<1x128x128xbf16>
      %36 = vector.shape_cast %35 : vector<1x128x128xbf16> to vector<128x128xbf16>
      %37 = vector.shape_cast %34 : vector<128x128xbf16> to vector<1x128x128xbf16>
      tpu.vector_store %arg9[%c0_21, %c0_22, %c0_23], %37 {strides = array<i32>} : memref<4x128x128xbf16, #tpu.memory_space<vmem>>, vector<1x128x128xbf16>,
      %c128 = arith.constant 128 : index
      %c0_24 = arith.constant 0 : index
      %38 = vector.load %arg4[%c128, %c0_24] : memref<256x128xf32, #tpu.memory_space<vmem>>, vector<128x128xf32>
      %39 = arith.truncf %38 : vector<128x128xf32> to vector<128x128xbf16>
      %c1 = arith.constant 1 : index
      %c0_25 = arith.constant 0 : index
      %c0_26 = arith.constant 0 : index
      %40 = vector.load %arg9[%c1, %c0_25, %c0_26] : memref<4x128x128xbf16, #tpu.memory_space<vmem>>, vector<1x128x128xbf16>
      %41 = vector.shape_cast %40 : vector<1x128x128xbf16> to vector<128x128xbf16>
      %42 = vector.shape_cast %39 : vector<128x128xbf16> to vector<1x128x128xbf16>
      tpu.vector_store %arg9[%c1, %c0_25, %c0_26], %42 {strides = array<i32>} : memref<4x128x128xbf16, #tpu.memory_space<vmem>>, vector<1x128x128xbf16>,
    } else {
    }
    %c0_i32_3 = arith.constant 0 : i32
    %7 = arith.cmpi eq, %arg2, %c0_i32_3 : i32
    %8 = arith.extui %7 : i1 to i32
    %c0_i32_4 = arith.constant 0 : i32
    %9 = arith.cmpi ne, %8, %c0_i32_4 : i32
    scf.if %9 {
      %cst_19 = arith.constant 0.000000e+00 : f32
      %33 = vector.broadcast %cst_19 : f32 to vector<128x128xf32>
      %c0_20 = arith.constant 0 : index
      %c0_21 = arith.constant 0 : index
      %34 = vector.load %arg8[%c0_20, %c0_21] : memref<128x128xf32, #tpu.memory_space<vmem>>, vector<128x128xf32>
      tpu.vector_store %arg8[%c0_20, %c0_21], %33 {strides = array<i32>} : memref<128x128xf32, #tpu.memory_space<vmem>>, vector<128x128xf32>,
    } else {
    }
    %c2_i32 = arith.constant 2 : i32
    %c0_i32_5 = arith.constant 0 : i32
    %10 = arith.cmpi eq, %c2_i32, %c0_i32_5 : i32
    %c1_i32 = arith.constant 1 : i32
    %11 = arith.select %10, %c1_i32, %c2_i32 : i32
    %12 = arith.remsi %arg0, %11 : i32
    %c0_i32_6 = arith.constant 0 : i32
    %13 = arith.cmpi ne, %12, %c0_i32_6 : i32
    %c0_i32_7 = arith.constant 0 : i32
    %14 = arith.cmpi slt, %12, %c0_i32_7 : i32
    %c0_i32_8 = arith.constant 0 : i32
    %15 = arith.cmpi slt, %11, %c0_i32_8 : i32
    %16 = arith.xori %14, %15 : i1
    %17 = arith.andi %16, %13 : i1
    %18 = arith.addi %12, %11 : i32
    %19 = arith.select %17, %18, %12 : i32
    %c2_i32_9 = arith.constant 2 : i32
    %20 = arith.muli %19, %c2_i32_9 : i32
    %c0 = arith.constant 0 : index
    %c0_10 = arith.constant 0 : index
    %21 = vector.load %arg8[%c0, %c0_10] : memref<128x128xf32, #tpu.memory_space<vmem>>, vector<128x128xf32>
    %c0_11 = arith.constant 0 : index
    %c0_12 = arith.constant 0 : index
    %22 = vector.load %arg3[%c0_11, %c0_12] : memref<128x128xbf16, #tpu.memory_space<vmem>>, vector<128x128xbf16>
    %23 = arith.addi %20, %arg2 : i32
    %24 = arith.index_cast %23 : i32 to index
    %c0_13 = arith.constant 0 : index
    %c0_14 = arith.constant 0 : index
    %25 = vector.load %arg9[%24, %c0_13, %c0_14] : memref<4x128x128xbf16, #tpu.memory_space<vmem>>, vector<1x128x128xbf16>
    %26 = vector.shape_cast %25 : vector<1x128x128xbf16> to vector<128x128xbf16>
    %cst = arith.constant dense<0.000000e+00> : vector<128x128xf32>
    %27 = tpu.matmul %22, %26, %cst {dimension_numbers = #tpu.dot_dimension_numbers<[1], [0], [0], [1], [0, 0, 1, 1], [], []>} : vector<128x128xbf16>, vector<128x128xbf16>, vector<128x128xf32> -> vector<128x128xf32>
    %28 = arith.addf %21, %27 : vector<128x128xf32>
    %c0_15 = arith.constant 0 : index
    %c0_16 = arith.constant 0 : index
    %29 = vector.load %arg8[%c0_15, %c0_16] : memref<128x128xf32, #tpu.memory_space<vmem>>, vector<128x128xf32>
    tpu.vector_store %arg8[%c0_15, %c0_16], %28 {strides = array<i32>} : memref<128x128xf32, #tpu.memory_space<vmem>>, vector<128x128xf32>,
    %c1_i32_17 = arith.constant 1 : i32
    %30 = arith.cmpi eq, %arg2, %c1_i32_17 : i32
    %31 = arith.extui %30 : i1 to i32
    %c0_i32_18 = arith.constant 0 : i32
    %32 = arith.cmpi ne, %31, %c0_i32_18 : i32
    scf.if %32 {
      %c128_i32 = arith.constant 128 : i32
      %33 = arith.muli %arg1, %c128_i32 : i32
      %34 = tpu.assume_multiple %33, 128 : i32
      %35 = arith.index_cast %34 : i32 to index
      %c0_19 = arith.constant 0 : index
      %36 = vector.load %arg4[%35, %c0_19] : memref<256x128xf32, #tpu.memory_space<vmem>>, vector<128x128xf32>
      %c0_20 = arith.constant 0 : index
      %c0_21 = arith.constant 0 : index
      %37 = vector.load %arg8[%c0_20, %c0_21] : memref<128x128xf32, #tpu.memory_space<vmem>>, vector<128x128xf32>
      %cst_22 = arith.constant 0.899999976 : f32
      %38 = vector.broadcast %cst_22 : f32 to vector<128x128xf32>
      %39 = arith.mulf %38, %37 : vector<128x128xf32>
      %cst_23 = arith.constant 1.000000e-01 : f32
      %40 = vector.broadcast %cst_23 : f32 to vector<128x128xf32>
      %41 = arith.mulf %40, %36 : vector<128x128xf32>
      %42 = arith.addf %39, %41 : vector<128x128xf32>
      %43 = arith.truncf %42 : vector<128x128xf32> to vector<128x128xbf16>
      %c0_24 = arith.constant 0 : index
      %c0_25 = arith.constant 0 : index
      %c0_26 = arith.constant 0 : index
      %44 = vector.load %arg5[%c0_24, %c0_25, %c0_26] : memref<1x128x128xbf16, #tpu.memory_space<vmem>>, vector<1x128x128xbf16>
      %45 = vector.shape_cast %44 : vector<1x128x128xbf16> to vector<128x128xbf16>
      %cst_27 = arith.constant dense<0.000000e+00> : vector<128x128xf32>
      %46 = tpu.matmul %43, %45, %cst_27 {dimension_numbers = #tpu.dot_dimension_numbers<[1], [0], [0], [1], [0, 0, 1, 1], [], []>} : vector<128x128xbf16>, vector<128x128xbf16>, vector<128x128xf32> -> vector<128x128xf32>
      %c0_28 = arith.constant 0 : index
      %c0_29 = arith.constant 0 : index
      %c0_30 = arith.constant 0 : index
      %47 = vector.load %arg6[%c0_28, %c0_29, %c0_30] : memref<1x1x128xf32, #tpu.memory_space<vmem>>, vector<1x1x128xf32>
      %48 = vector.shape_cast %47 : vector<1x1x128xf32> to vector<1x128xf32>
      %49 = vector.broadcast %48 : vector<1x128xf32> to vector<128x128xf32>
      %50 = arith.addf %46, %49 : vector<128x128xf32>
      %cst_31 = arith.constant 0.000000e+00 : f32
      %51 = vector.broadcast %cst_31 : f32 to vector<128x128xf32>
      %52 = arith.maximumf %50, %51 : vector<128x128xf32>
      %53 = arith.truncf %52 : vector<128x128xf32> to vector<128x128xbf16>
      %c1_i32_32 = arith.constant 1 : i32
      %54 = arith.addi %arg0, %c1_i32_32 : i32
      %c2_i32_33 = arith.constant 2 : i32
      %c0_i32_34 = arith.constant 0 : i32
      %55 = arith.cmpi eq, %c2_i32_33, %c0_i32_34 : i32
      %c1_i32_35 = arith.constant 1 : i32
      %56 = arith.select %55, %c1_i32_35, %c2_i32_33 : i32
      %57 = arith.remsi %54, %56 : i32
      %c0_i32_36 = arith.constant 0 : i32
      %58 = arith.cmpi ne, %57, %c0_i32_36 : i32
      %c0_i32_37 = arith.constant 0 : i32
      %59 = arith.cmpi slt, %57, %c0_i32_37 : i32
      %c0_i32_38 = arith.constant 0 : i32
      %60 = arith.cmpi slt, %56, %c0_i32_38 : i32
      %61 = arith.xori %59, %60 : i1
      %62 = arith.andi %61, %58 : i1
      %63 = arith.addi %57, %56 : i32
      %64 = arith.select %62, %63, %57 : i32
      %c2_i32_39 = arith.constant 2 : i32
      %65 = arith.muli %64, %c2_i32_39 : i32
      %66 = arith.addi %65, %arg1 : i32
      %67 = arith.index_cast %66 : i32 to index
      %c0_40 = arith.constant 0 : index
      %c0_41 = arith.constant 0 : index
      %68 = vector.load %arg9[%67, %c0_40, %c0_41] : memref<4x128x128xbf16, #tpu.memory_space<vmem>>, vector<1x128x128xbf16>
      %69 = vector.shape_cast %68 : vector<1x128x128xbf16> to vector<128x128xbf16>
      %70 = vector.shape_cast %53 : vector<128x128xbf16> to vector<1x128x128xbf16>
      tpu.vector_store %arg9[%67, %c0_40, %c0_41], %70 {strides = array<i32>} : memref<4x128x128xbf16, #tpu.memory_space<vmem>>, vector<1x128x128xbf16>,
      %c3_i32 = arith.constant 3 : i32
      %71 = arith.cmpi eq, %arg0, %c3_i32 : i32
      %72 = arith.extui %71 : i1 to i32
      %c0_i32_42 = arith.constant 0 : i32
      %73 = arith.cmpi ne, %72, %c0_i32_42 : i32
      scf.if %73 {
        %c0_43 = arith.constant 0 : index
        %c0_44 = arith.constant 0 : index
        %74 = vector.load %arg7[%c0_43, %c0_44] : memref<128x128xbf16, #tpu.memory_space<vmem>>, vector<128x128xbf16>
        tpu.vector_store %arg7[%c0_43, %c0_44], %53 {strides = array<i32>} : memref<128x128xbf16, #tpu.memory_space<vmem>>, vector<128x128xbf16>,
      } else {
      }
    } else {
    }
    return
  }
  func.func @transform_0(%arg0: i32, %arg1: i32, %arg2: i32) -> (i32, i32) {
    %c0_i32 = arith.constant 0 : i32
    return %arg1, %arg2 : i32, i32
  }
  func.func @transform_1(%arg0: i32, %arg1: i32, %arg2: i32) -> (i32, i32) {
    %c0_i32 = arith.constant 0 : i32
    %c0_i32_0 = arith.constant 0 : i32
    %c0_i32_1 = arith.constant 0 : i32
    return %c0_i32, %c0_i32_0 : i32, i32
  }
  func.func @transform_2(%arg0: i32, %arg1: i32, %arg2: i32) -> (i32, i32, i32) {
    %c0_i32 = arith.constant 0 : i32
    %c0_i32_0 = arith.constant 0 : i32
    %c0_i32_1 = arith.constant 0 : i32
    return %arg0, %c0_i32, %c0_i32_0 : i32, i32, i32
  }
  func.func @transform_3(%arg0: i32, %arg1: i32, %arg2: i32) -> (i32, i32, i32) {
    %c0_i32 = arith.constant 0 : i32
    %c0_i32_0 = arith.constant 0 : i32
    %c0_i32_1 = arith.constant 0 : i32
    return %arg0, %c0_i32, %c0_i32_0 : i32, i32, i32
  }
  func.func @transform_4(%arg0: i32, %arg1: i32, %arg2: i32) -> (i32, i32) {
    %c0_i32 = arith.constant 0 : i32
    %c0_i32_0 = arith.constant 0 : i32
    return %arg1, %c0_i32 : i32, i32
  }
}

module attributes {stable_mosaic.version = 11 : i64} {
  func.func @fc_logsoftmax_kernel(%arg0: i32, %arg1: memref<128x128xbf16, #tpu.memory_space<vmem>>, %arg2: memref<128x128xbf16, #tpu.memory_space<vmem>>, %arg3: memref<1x128xf32, #tpu.memory_space<vmem>>, %arg4: memref<128x128xf32, #tpu.memory_space<vmem>>) attributes {dimension_semantics = [#tpu.dimension_semantics<parallel>], iteration_bounds = array<i64: 2>, scalar_prefetch = 0 : i64, scratch_operands = 0 : i64, tpu.core_type = #tpu.core_type<tc>, window_params = [{transform_indices = @transform_0, window_bounds = array<i64: 128, 128>}, {pipeline_mode = #tpu.pipeline_mode<synchronous>, transform_indices = @transform_1, window_bounds = array<i64: 128, 128>}, {pipeline_mode = #tpu.pipeline_mode<synchronous>, transform_indices = @transform_2, window_bounds = array<i64: 1, 128>}, {transform_indices = @transform_3, window_bounds = array<i64: 128, 128>}]} {
    %c0 = arith.constant 0 : index
    %c0_0 = arith.constant 0 : index
    %0 = vector.load %arg1[%c0, %c0_0] : memref<128x128xbf16, #tpu.memory_space<vmem>>, vector<128x128xbf16>
    %c0_1 = arith.constant 0 : index
    %c0_2 = arith.constant 0 : index
    %1 = vector.load %arg2[%c0_1, %c0_2] : memref<128x128xbf16, #tpu.memory_space<vmem>>, vector<128x128xbf16>
    %cst = arith.constant dense<0.000000e+00> : vector<128x128xf32>
    %2 = tpu.matmul %0, %1, %cst {dimension_numbers = #tpu.dot_dimension_numbers<[1], [0], [0], [1], [0, 0, 1, 1], [], []>} : vector<128x128xbf16>, vector<128x128xbf16>, vector<128x128xf32> -> vector<128x128xf32>
    %c0_3 = arith.constant 0 : index
    %c0_4 = arith.constant 0 : index
    %3 = vector.load %arg3[%c0_3, %c0_4] : memref<1x128xf32, #tpu.memory_space<vmem>>, vector<1x128xf32>
    %4 = vector.broadcast %3 : vector<1x128xf32> to vector<128x128xf32>
    %5 = arith.addf %2, %4 : vector<128x128xf32>
    %6 = tpu.iota {dimensions = array<i32: 1>} : vector<128x128xi32>
    %c8_i32 = arith.constant 8 : i32
    %7 = vector.broadcast %c8_i32 : i32 to vector<128x128xi32>
    %8 = arith.cmpi slt, %6, %7 : vector<128x128xi32>
    %cst_5 = arith.constant 0xFF800000 : f32
    %9 = vector.broadcast %cst_5 : f32 to vector<128x128xf32>
    %10 = arith.select %8, %5, %9 : vector<128x128xi1>, vector<128x128xf32>
    %cst_6 = arith.constant dense<0xFF800000> : vector<128xf32>
    %11 = vector.multi_reduction <maximumf>, %10, %cst_6 [1] : vector<128x128xf32> to vector<128xf32>
    %12 = vector.shape_cast %11 : vector<128xf32> to vector<128x1xf32>
    %13 = vector.broadcast %12 : vector<128x1xf32> to vector<128x128xf32>
    %14 = arith.subf %10, %13 : vector<128x128xf32>
    %15 = math.exp %14 : vector<128x128xf32>
    %cst_7 = arith.constant dense<0.000000e+00> : vector<128xf32>
    %16 = vector.multi_reduction <add>, %15, %cst_7 [1] : vector<128x128xf32> to vector<128xf32>
    %17 = vector.shape_cast %16 : vector<128xf32> to vector<128x1xf32>
    %18 = math.log %17 : vector<128x1xf32>
    %19 = arith.addf %12, %18 : vector<128x1xf32>
    %20 = vector.broadcast %19 : vector<128x1xf32> to vector<128x128xf32>
    %21 = arith.subf %10, %20 : vector<128x128xf32>
    %c0_8 = arith.constant 0 : index
    %c0_9 = arith.constant 0 : index
    %22 = vector.load %arg4[%c0_8, %c0_9] : memref<128x128xf32, #tpu.memory_space<vmem>>, vector<128x128xf32>
    tpu.vector_store %arg4[%c0_8, %c0_9], %21 {strides = array<i32>} : memref<128x128xf32, #tpu.memory_space<vmem>>, vector<128x128xf32>,
    return
  }
  func.func @transform_0(%arg0: i32) -> (i32, i32) {
    %c0_i32 = arith.constant 0 : i32
    %c0_i32_0 = arith.constant 0 : i32
    return %arg0, %c0_i32 : i32, i32
  }
  func.func @transform_1(%arg0: i32) -> (i32, i32) {
    %c0_i32 = arith.constant 0 : i32
    %c0_i32_0 = arith.constant 0 : i32
    %c0_i32_1 = arith.constant 0 : i32
    return %c0_i32, %c0_i32_0 : i32, i32
  }
  func.func @transform_2(%arg0: i32) -> (i32, i32) {
    %c0_i32 = arith.constant 0 : i32
    %c0_i32_0 = arith.constant 0 : i32
    %c0_i32_1 = arith.constant 0 : i32
    return %c0_i32, %c0_i32_0 : i32, i32
  }
  func.func @transform_3(%arg0: i32) -> (i32, i32) {
    %c0_i32 = arith.constant 0 : i32
    %c0_i32_0 = arith.constant 0 : i32
    return %arg0, %c0_i32 : i32, i32
  }
}

</mosaic_0001>

<bundles_post_ra>
// kernel: gcnii_forward.3
= control target key start
LH: loop header
LB: loop body
LE: loop exit
PB: predicated region body
PF: predicated region fallthrough
CT: control target
= control target key end

     0   :  { %s595_s12 = smov 0   ;;  %s661_s0 = inlined_call_operand.vmem [shape: bf16[256,128], index: 0, kind: input, shape index: {}]   ;;  %s662_s1 = inlined_call_operand.vmem [shape: bf16[128,128], index: 1, kind: input, shape index: {}]   ;;  %s663_s2 = inlined_call_operand.vmem [shape: f32[1,128], index: 2, kind: input, shape index: {}]   ;;  %s664_s3 = inlined_call_operand.vmem [shape: f32[256,128], index: 3, kind: output, shape index: {}]  }
   0x1 LB: > { %s443_s13 = sadd.s32 4294967295, %s573_s12   ;;  %p447_p0 = scmp.ge.s32.totalorder %s573_s12, 1  ;;  %s573_s12 = sphi %s595_s12, %s13_s12  }
   0x2   : > { %p138_p1 = scmp.lt.s32.totalorder %s573_s12, 3 }
   0x4   : > { %p139_p2 = pnand %p447_p0, %p138_p1 }
   0x5   : > { %s448_s22 = sshll.u32 (!%p139_p2), %s443_s13, 4 }
   0x6   : > { %142 = sbr.rel (%p139_p2) target bundleno = 206 (0xce), region = 32  ;;  %p163_p3 = scmp.lt.s32.totalorder (!%p139_p2), %s448_s22, 31 }
   0xb   : > { %v533_v0 = vld [vmem:[%s662_s1 + $0x38] sm:$0xff]  ;;  %v532_v1 = vld [vmem:[%s662_s1 + $0x30] sm:$0xff]  ;;  %v531_v2 = vld [vmem:[%s662_s1 + $0x28] sm:$0xff]  ;;  %s666_s22 = smov (!%p163_p3, %s448_s22), 31 }
   0xc   : > { %306 = vmatpush.bf16.msra.mxu0 %v533_v0  ;;  %534 = vmatpush.bf16.msra.mxu1 %v533_v0  ;;  %v530_v3 = vld [vmem:[%s662_s1 + $0x20] sm:$0xff]  ;;  %v529_v4 = vld [vmem:[%s662_s1 + $0x18] sm:$0xff]  ;;  %v528_v5 = vld [vmem:[%s662_s1 + $0x10] sm:$0xff]  ;;  %s449_s29 = sshll.u32 %s666_s22, 2  ;;  %s451_s10 = sshll.u32 %s666_s22, 3 }
   0xd   : > { %535 = vmatpush.bf16.msra.mxu2 %v533_v0  ;;  %536 = vmatpush.bf16.msra.mxu3 %v533_v0  ;;  %v527_v6 = vld [vmem:[%s662_s1 + $0x8] sm:$0xff]  ;;  %v526_v7 = vld [vmem:[%s662_s1] sm:$0xff]  ;;  %s166_s7 = scalar_lea.vmem %s661_s0, %s449_s29  ;;  %s640_s14 = scalar_lea.vmem %s664_s3, %s451_s10 }
   0xe   : > { %v518_v8 = vld [vmem:[%s166_s7] sm:$0xff]  ;;  %v520_v9 = vld [vmem:[%s166_s7 + $0x10] sm:$0xff]  ;;  %v519_v12 = vld [vmem:[%s166_s7 + $0x8] sm:$0xff] }
   0xf   : > { %v522_v10 = vld [vmem:[%s166_s7 + $0x20] sm:$0xff]  ;;  %v524_v11 = vld [vmem:[%s166_s7 + $0x30] sm:$0xff]  ;;  %v521_v13 = vld [vmem:[%s166_s7 + $0x18] sm:$0xff] }
  0x10   : > { %307 = vmatpush.bf16.msra.mxu0 %v532_v1  ;;  %537 = vmatpush.bf16.msra.mxu1 %v532_v1  ;;  %v523_v14 = vld [vmem:[%s166_s7 + $0x28] sm:$0xff]  ;;  %v525_v15 = vld [vmem:[%s166_s7 + $0x38] sm:$0xff]  ;;  %v566_v16 = vld [vmem:[%s663_s2] ss:$0 sm:$0xff] }
  0x11   : > { %538 = vmatpush.bf16.msra.mxu2 %v532_v1  ;;  %539 = vmatpush.bf16.msra.mxu3 %v532_v1 }
  0x14   : > { %308 = vmatpush.bf16.msra.mxu0 %v531_v2  ;;  %540 = vmatpush.bf16.msra.mxu1 %v531_v2 }
  0x15   : > { %541 = vmatpush.bf16.msra.mxu2 %v531_v2  ;;  %542 = vmatpush.bf16.msra.mxu3 %v531_v2 }
  0x18   : > { %309 = vmatpush.bf16.msra.mxu0 %v530_v3  ;;  %543 = vmatpush.bf16.msra.mxu1 %v530_v3 }
  0x19   : > { %544 = vmatpush.bf16.msra.mxu2 %v530_v3  ;;  %545 = vmatpush.bf16.msra.mxu3 %v530_v3 }
  0x1c   : > { %310 = vmatpush.bf16.msra.mxu0 %v529_v4  ;;  %546 = vmatpush.bf16.msra.mxu1 %v529_v4 }
  0x1d   : > { %547 = vmatpush.bf16.msra.mxu2 %v529_v4  ;;  %548 = vmatpush.bf16.msra.mxu3 %v529_v4 }
  0x20   : > { %311 = vmatpush.bf16.msra.mxu0 %v528_v5  ;;  %549 = vmatpush.bf16.msra.mxu1 %v528_v5 }
  0x21   : > { %550 = vmatpush.bf16.msra.mxu2 %v528_v5  ;;  %551 = vmatpush.bf16.msra.mxu3 %v528_v5 }
  0x24   : > { %312 = vmatpush.bf16.msra.mxu0 %v527_v6  ;;  %552 = vmatpush.bf16.msra.mxu1 %v527_v6 }
  0x25   : > { %553 = vmatpush.bf16.msra.mxu2 %v527_v6  ;;  %554 = vmatpush.bf16.msra.mxu3 %v527_v6 }
  0x28   : > { %313 = vmatpush.bf16.msra.mxu0 %v526_v7  ;;  %555 = vmatpush.bf16.msra.mxu1 %v526_v7 }
  0x29   : > { %556 = vmatpush.bf16.msra.mxu2 %v526_v7  ;;  %557 = vmatpush.bf16.msra.mxu3 %v526_v7 }
  0x2b   : > { %314 = vmatmul.bf16.vlgmr.msra.gmra.mxu0 %v518_v8  ;;  %324 = vmatmul.bf16.vlgmr.msra.gmra.mxu1 %v520_v9 }
  0x2c   : > { %334 = vmatmul.bf16.vlgmr.msra.gmra.mxu2 %v522_v10  ;;  %344 = vmatmul.bf16.vlgmr.msra.gmra.mxu3 %v524_v11 }
  0x3b   : > { %319 = vmatmul.bf16.gmra.mxu0 %v519_v12  ;;  %329 = vmatmul.bf16.gmra.mxu1 %v521_v13 }
  0x3c   : > { %339 = vmatmul.bf16.gmra.mxu2 %v523_v14  ;;  %349 = vmatmul.bf16.gmra.mxu3 %v525_v15 }
  0xa8   : > { %v315_v17 = vpop.f32.mrf.mxu0  ;;  %v325_v18 = vpop.f32.mrf.mxu1 }
  0xa9   : > { %v316_v19 = vadd.f32 %v566_v16, %v315_v17  ;;  %v326_v20 = vadd.f32 %v566_v16, %v325_v18 }
  0xab   : > { %v355_v21 = vmax.f32 %v316_v19, 0.0  ;;  %v359_v22 = vmax.f32 %v326_v20, 0.0 }
  0xad   : > { %371 = vst [vmem:[%s640_s14] sm:$0xff] %v355_v21 }
  0xae   : > { %375 = vst [vmem:[%s640_s14 + $0x20] sm:$0xff] %v359_v22 }
  0xaf   : > { %v335_v23 = vpop.f32.mrf.mxu2  ;;  %v345_v24 = vpop.f32.mrf.mxu3 }
  0xb0   : > { %v336_v25 = vadd.f32 %v566_v16, %v335_v23  ;;  %v346_v26 = vadd.f32 %v566_v16, %v345_v24  ;;  %v317_v27 = vpop.f32.mrf.mxu0  ;;  %v327_v28 = vpop.f32.mrf.mxu1 }
  0xb1   : > { %v318_v29 = vadd.f32 %v566_v16, %v317_v27  ;;  %v328_v30 = vadd.f32 %v566_v16, %v327_v28 }
  0xb2   : > { %v363_v31 = vmax.f32 %v336_v25, 0.0  ;;  %v367_v32 = vmax.f32 %v346_v26, 0.0 }
  0xb3   : > { %v356_v33 = vmax.f32 %v318_v29, 0.0  ;;  %v360_v34 = vmax.f32 %v328_v30, 0.0 }
  0xb4   : > { %379 = vst [vmem:[%s640_s14 + $0x40] sm:$0xff] %v363_v31 }
  0xb5   : > { %383 = vst [vmem:[%s640_s14 + $0x60] sm:$0xff] %v367_v32 }
  0xb6   : > { %372 = vst [vmem:[%s640_s14 + $0x8] sm:$0xff] %v356_v33 }
  0xb7   : > { %376 = vst [vmem:[%s640_s14 + $0x28] sm:$0xff] %v360_v34  ;;  %v337_v35 = vpop.f32.mrf.mxu2  ;;  %v347_v36 = vpop.f32.mrf.mxu3 }
  0xb8   : > { %v338_v37 = vadd.f32 %v566_v16, %v337_v35  ;;  %v348_v38 = vadd.f32 %v566_v16, %v347_v36  ;;  %v320_v39 = vpop.f32.mrf.mxu0  ;;  %v330_v40 = vpop.f32.mrf.mxu1 }
  0xb9   : > { %v321_v41 = vadd.f32 %v566_v16, %v320_v39  ;;  %v331_v42 = vadd.f32 %v566_v16, %v330_v40 }
  0xba   : > { %v364_v43 = vmax.f32 %v338_v37, 0.0  ;;  %v368_v44 = vmax.f32 %v348_v38, 0.0 }
  0xbb   : > { %v357_v45 = vmax.f32 %v321_v41, 0.0  ;;  %v361_v46 = vmax.f32 %v331_v42, 0.0 }
  0xbc   : > { %380 = vst [vmem:[%s640_s14 + $0x48] sm:$0xff] %v364_v43 }
  0xbd   : > { %384 = vst [vmem:[%s640_s14 + $0x68] sm:$0xff] %v368_v44 }
  0xbe   : > { %373 = vst [vmem:[%s640_s14 + $0x10] sm:$0xff] %v357_v45 }
  0xbf   : > { %377 = vst [vmem:[%s640_s14 + $0x30] sm:$0xff] %v361_v46  ;;  %v340_v47 = vpop.f32.mrf.mxu2  ;;  %v350_v48 = vpop.f32.mrf.mxu3 }
  0xc0   : > { %v341_v49 = vadd.f32 %v566_v16, %v340_v47  ;;  %v351_v50 = vadd.f32 %v566_v16, %v350_v48  ;;  %v322_v51 = vpop.f32.mrf.mxu0  ;;  %v332_v52 = vpop.f32.mrf.mxu1 }
  0xc1   : > { %v323_v53 = vadd.f32 %v566_v16, %v322_v51  ;;  %v333_v54 = vadd.f32 %v566_v16, %v332_v52 }
  0xc2   : > { %v365_v55 = vmax.f32 %v341_v49, 0.0  ;;  %v369_v56 = vmax.f32 %v351_v50, 0.0 }
  0xc3   : > { %v358_v57 = vmax.f32 %v323_v53, 0.0  ;;  %v362_v58 = vmax.f32 %v333_v54, 0.0 }
  0xc4   : > { %381 = vst [vmem:[%s640_s14 + $0x50] sm:$0xff] %v365_v55 }
  0xc5   : > { %385 = vst [vmem:[%s640_s14 + $0x70] sm:$0xff] %v369_v56 }
  0xc6   : > { %374 = vst [vmem:[%s640_s14 + $0x18] sm:$0xff] %v358_v57 }
  0xc7   : > { %378 = vst [vmem:[%s640_s14 + $0x38] sm:$0xff] %v362_v58  ;;  %v342_v59 = vpop.f32.mrf.mxu2  ;;  %v352_v60 = vpop.f32.mrf.mxu3 }
  0xc8   : > { %v343_v61 = vadd.f32 %v566_v16, %v342_v59  ;;  %v353_v62 = vadd.f32 %v566_v16, %v352_v60 }
  0xca   : > { %v366_v63 = vmax.f32 %v343_v61, 0.0  ;;  %v370_v0 = vmax.f32 %v353_v62, 0.0 }
  0xcc   : > { %382 = vst [vmem:[%s640_s14 + $0x58] sm:$0xff] %v366_v63 }
  0xcd   : > { %386 = vst [vmem:[%s640_s14 + $0x78] sm:$0xff] %v370_v0 }
  0xce PF: > { %s13_s12 = sadd.s32 1, %s573_s12  }
  0xcf   : > { %p10_p4 = scmp.ge.s32.totalorder %s13_s12, 4  }
  0xd1   :  { %12 = sbr.rel (!%p10_p4) target bundleno = 1 (0x1), region = 62 }

// kernel: gcnii_forward.5
= control target key start
LH: loop header
LB: loop body
LE: loop exit
PB: predicated region body
PF: predicated region fallthrough
CT: control target
= control target key end

     0   :  { %s838_s12 = smov 0   ;;  %s1101_s0 = inlined_call_operand.vmem [shape: bf16[256,128], index: 0, kind: input, shape index: {}]   ;;  %s1102_s1 = inlined_call_operand.vmem [shape: bf16[128,128], index: 1, kind: input, shape index: {}]   ;;  %s1103_s2 = inlined_call_operand.vmem [shape: f32[1,128], index: 2, kind: input, shape index: {}]   ;;  %s1104_s3 = inlined_call_operand.vmem [shape: f32[256,128], index: 3, kind: output, shape index: {}]  }
   0x1 LB: > { %s622_s13 = sadd.s32 4294967295, %s816_s12   ;;  %p626_p0 = scmp.ge.s32.totalorder %s816_s12, 1  ;;  %s816_s12 = sphi %s838_s12, %s13_s12  }
   0x2   : > { %p138_p1 = scmp.lt.s32.totalorder %s816_s12, 3 }
   0x4   : > { %p139_p2 = pnand %p626_p0, %p138_p1 }
   0x5   : > { %s627_s22 = sshll.u32 (!%p139_p2), %s622_s13, 4 }
   0x6   : > { %142 = sbr.rel (%p139_p2) target bundleno = 478 (0x1de), region = 32  ;;  %p163_p3 = scmp.lt.s32.totalorder (!%p139_p2), %s627_s22, 31 }
   0xb   : > { %v712_v0 = vld [vmem:[%s1102_s1 + $0x38] sm:$0xff]  ;;  %v711_v1 = vld [vmem:[%s1102_s1 + $0x30] sm:$0xff]  ;;  %v710_v2 = vld [vmem:[%s1102_s1 + $0x28] sm:$0xff]  ;;  %s1106_s22 = smov (!%p163_p3, %s627_s22), 31  ;;  %v355_v16 = vlaneseq }
   0xc   : > { %306 = vmatpush.bf16.msra.mxu0 %v712_v0  ;;  %713 = vmatpush.bf16.msra.mxu1 %v712_v0  ;;  %v709_v3 = vld [vmem:[%s1102_s1 + $0x20] sm:$0xff]  ;;  %v708_v4 = vld [vmem:[%s1102_s1 + $0x18] sm:$0xff]  ;;  %v707_v5 = vld [vmem:[%s1102_s1 + $0x10] sm:$0xff]  ;;  %s628_s29 = sshll.u32 %s1106_s22, 2  ;;  %s630_s10 = sshll.u32 %s1106_s22, 3 }
   0xd   : > { %714 = vmatpush.bf16.msra.mxu2 %v712_v0  ;;  %715 = vmatpush.bf16.msra.mxu3 %v712_v0  ;;  %v706_v6 = vld [vmem:[%s1102_s1 + $0x8] sm:$0xff]  ;;  %v705_v7 = vld [vmem:[%s1102_s1] sm:$0xff]  ;;  %s166_s7 = scalar_lea.vmem %s1101_s0, %s628_s29  ;;  %v876_v17 = vand.u32 127, %v355_v16  ;;  %s1049_s14 = scalar_lea.vmem %s1104_s3, %s630_s10 }
   0xe   : > { %v697_v8 = vld [vmem:[%s166_s7] sm:$0xff]  ;;  %v699_v9 = vld [vmem:[%s166_s7 + $0x10] sm:$0xff]  ;;  %v698_v12 = vld [vmem:[%s166_s7 + $0x8] sm:$0xff] }
   0xf   : > { %v701_v10 = vld [vmem:[%s166_s7 + $0x20] sm:$0xff]  ;;  %v703_v11 = vld [vmem:[%s166_s7 + $0x30] sm:$0xff]  ;;  %v700_v13 = vld [vmem:[%s166_s7 + $0x18] sm:$0xff]  ;;  %vm357_vm0 = vcmp.lt.s32.totalorder %v876_v17, 8 }
  0x10   : > { %307 = vmatpush.bf16.msra.mxu0 %v711_v1  ;;  %716 = vmatpush.bf16.msra.mxu1 %v711_v1  ;;  %v702_v14 = vld [vmem:[%s166_s7 + $0x28] sm:$0xff]  ;;  %v704_v15 = vld [vmem:[%s166_s7 + $0x38] sm:$0xff]  ;;  %v881_v18 = vld [vmem:[%s1103_s2] ss:$0 sm:$0xff] }
  0x11   : > { %717 = vmatpush.bf16.msra.mxu2 %v711_v1  ;;  %718 = vmatpush.bf16.msra.mxu3 %v711_v1 }
  0x14   : > { %308 = vmatpush.bf16.msra.mxu0 %v710_v2  ;;  %719 = vmatpush.bf16.msra.mxu1 %v710_v2 }
  0x15   : > { %720 = vmatpush.bf16.msra.mxu2 %v710_v2  ;;  %721 = vmatpush.bf16.msra.mxu3 %v710_v2 }
  0x18   : > { %309 = vmatpush.bf16.msra.mxu0 %v709_v3  ;;  %722 = vmatpush.bf16.msra.mxu1 %v709_v3 }
  0x19   : > { %723 = vmatpush.bf16.msra.mxu2 %v709_v3  ;;  %724 = vmatpush.bf16.msra.mxu3 %v709_v3 }
  0x1c   : > { %310 = vmatpush.bf16.msra.mxu0 %v708_v4  ;;  %725 = vmatpush.bf16.msra.mxu1 %v708_v4 }
  0x1d   : > { %726 = vmatpush.bf16.msra.mxu2 %v708_v4  ;;  %727 = vmatpush.bf16.msra.mxu3 %v708_v4 }
  0x20   : > { %311 = vmatpush.bf16.msra.mxu0 %v707_v5  ;;  %728 = vmatpush.bf16.msra.mxu1 %v707_v5 }
  0x21   : > { %729 = vmatpush.bf16.msra.mxu2 %v707_v5  ;;  %730 = vmatpush.bf16.msra.mxu3 %v707_v5 }
  0x24   : > { %312 = vmatpush.bf16.msra.mxu0 %v706_v6  ;;  %731 = vmatpush.bf16.msra.mxu1 %v706_v6 }
  0x25   : > { %732 = vmatpush.bf16.msra.mxu2 %v706_v6  ;;  %733 = vmatpush.bf16.msra.mxu3 %v706_v6 }
  0x28   : > { %313 = vmatpush.bf16.msra.mxu0 %v705_v7  ;;  %734 = vmatpush.bf16.msra.mxu1 %v705_v7 }
  0x29   : > { %735 = vmatpush.bf16.msra.mxu2 %v705_v7  ;;  %736 = vmatpush.bf16.msra.mxu3 %v705_v7 }
  0x2b   : > { %314 = vmatmul.bf16.vlgmr.msra.gmra.mxu0 %v697_v8  ;;  %324 = vmatmul.bf16.vlgmr.msra.gmra.mxu1 %v699_v9 }
  0x2c   : > { %334 = vmatmul.bf16.vlgmr.msra.gmra.mxu2 %v701_v10  ;;  %344 = vmatmul.bf16.vlgmr.msra.gmra.mxu3 %v703_v11 }
  0x3b   : > { %319 = vmatmul.bf16.gmra.mxu0 %v698_v12  ;;  %329 = vmatmul.bf16.gmra.mxu1 %v700_v13 }
  0x3c   : > { %339 = vmatmul.bf16.gmra.mxu2 %v702_v14  ;;  %349 = vmatmul.bf16.gmra.mxu3 %v704_v15 }
  0xa8   : > { %v315_v19 = vpop.f32.mrf.mxu0  ;;  %v325_v20 = vpop.f32.mrf.mxu1 }
  0xa9   : > { %v316_v21 = vadd.f32 %v881_v18, %v315_v19  ;;  %v326_v22 = vadd.f32 %v881_v18, %v325_v20 }
  0xab   : > { %v888_v23 = vsel %vm357_vm0, %v326_v22, -inf  ;;  %v892_v24 = vsel %vm357_vm0, %v316_v21, -inf }
  0xac   : > { %382 = vmax.xlane.f32.xlu2 %v888_v23  ;;  %374 = vmax.xlane.f32.xlu0 %v892_v24 }
  0xaf   : > { %v335_v25 = vpop.f32.mrf.mxu2  ;;  %v345_v26 = vpop.f32.mrf.mxu3 }
  0xb0   : > { %v336_v27 = vadd.f32 %v881_v18, %v335_v25  ;;  %v346_v28 = vadd.f32 %v881_v18, %v345_v26  ;;  %v317_v29 = vpop.f32.mrf.mxu0  ;;  %v327_v32 = vpop.f32.mrf.mxu1 }
  0xb1   : > { %v328_v33 = vadd.f32 %v881_v18, %v327_v32  ;;  %v318_v35 = vadd.f32 %v881_v18, %v317_v29 }
  0xb2   : > { %v900_v30 = vsel %vm357_vm0, %v336_v27, -inf  ;;  %v904_v31 = vsel %vm357_vm0, %v346_v28, -inf }
  0xb3   : > { %v913_v39 = vsel %vm357_vm0, %v328_v33, -inf  ;;  %v923_v41 = vsel %vm357_vm0, %v318_v35, -inf }
  0xb4   : > { %390 = vmax.xlane.f32.xlu2 %v900_v30  ;;  %398 = vmax.xlane.f32.xlu0 %v904_v31 }
  0xb7   : > { %v337_v34 = vpop.f32.mrf.mxu2  ;;  %v347_v37 = vpop.f32.mrf.mxu3 }
  0xb8   : > { %v320_v36 = vpop.f32.mrf.mxu0  ;;  %v338_v43 = vadd.f32 %v881_v18, %v337_v34  ;;  %v330_v46 = vpop.f32.mrf.mxu1  ;;  %v348_v1 = vadd.f32 %v881_v18, %v347_v37 }
  0xb9   : > { %v321_v38 = vadd.f32 %v881_v18, %v320_v36  ;;  %v331_v50 = vadd.f32 %v881_v18, %v330_v46 }
  0xba   : > { %v935_v49 = vsel %vm357_vm0, %v338_v43, -inf  ;;  %v977_v2 = vsel %vm357_vm0, %v348_v1, -inf }
  0xbb   : > { %v917_v40 = vsel %vm357_vm0, %v321_v38, -inf  ;;  %v947_v55 = vsel %vm357_vm0, %v331_v50, -inf }
  0xbc   : > { %384 = vmax.xlane.f32.xlu2 %v913_v39  ;;  %378 = vmax.xlane.f32.xlu1 %v917_v40 }
  0xbd   : > { %376 = vmax.xlane.f32.xlu0 %v923_v41 }
  0xbf   : > { %v340_v42 = vpop.f32.mrf.mxu2  ;;  %v350_v45 = vpop.f32.mrf.mxu3 }
  0xc0   : > { %v341_v44 = vadd.f32 %v881_v18, %v340_v42  ;;  %v322_v48 = vpop.f32.mrf.mxu0  ;;  %v332_v58 = vpop.f32.mrf.mxu1  ;;  %v351_v59 = vadd.f32 %v881_v18, %v350_v45 }
  0xc1   : > { %v323_v51 = vadd.f32 %v881_v18, %v322_v48  ;;  %v333_v61 = vadd.f32 %v881_v18, %v332_v58 }
  0xc2   : > { %v930_v47 = vsel %vm357_vm0, %v341_v44, -inf  ;;  %v961_v62 = vsel %vm357_vm0, %v351_v59, -inf }
  0xc3   : > { %v952_v56 = vsel %vm357_vm0, %v323_v51, -inf  ;;  %v970_v0 = vsel %vm357_vm0, %v333_v61, -inf }
  0xc4   : > { %394 = vmax.xlane.f32.xlu1 %v930_v47 }
  0xc5   : > { %392 = vmax.xlane.f32.xlu0 %v935_v49 }
  0xc7   : > { %v342_v52 = vpop.f32.mrf.mxu2  ;;  %v352_v57 = vpop.f32.mrf.mxu3 }
  0xc8   : > { %v343_v53 = vadd.f32 %v881_v18, %v342_v52  ;;  %v353_v60 = vadd.f32 %v881_v18, %v352_v57 }
  0xca   : > { %v943_v54 = vsel %vm357_vm0, %v343_v53, -inf  ;;  %v965_v63 = vsel %vm357_vm0, %v353_v60, -inf }
  0xcb   : > { %396 = vmax.xlane.f32.xlu2 %v943_v54 }
  0xcc   : > { %380 = vmax.xlane.f32.xlu1 %v952_v56 }
  0xcd   : > { %386 = vmax.xlane.f32.xlu0 %v947_v55 }
  0xd3   : > { %402 = vmax.xlane.f32.xlu2 %v961_v62 }
  0xd4   : > { %388 = vmax.xlane.f32.xlu1 %v970_v0 }
  0xd5   : > { %404 = vmax.xlane.f32.xlu0 %v965_v63 }
  0xdc   : > { %400 = vmax.xlane.f32.xlu1 %v977_v2 }
 0x11f   : > { %v980_v3 = vpop.xlane.xlu2 %382  ;;  %v982_v4 = vpop.xlane.xlu0 %374 }
 0x120   : > { %v410_v5 = vsub.f32 %v888_v23, %v980_v3  ;;  %v406_v6 = vsub.f32 %v892_v24, %v982_v4 }
 0x122   : > { %v430_v7 = vmul.f32 1.442695, %v410_v5  ;;  %v422_v8 = vmul.f32 1.442695, %v406_v6 }
 0x124   : > { %746 = vpow2.f32 %v430_v7 }
 0x125   : > { %748 = vpow2.f32 %v422_v8 }
 0x127   : > { %v988_v9 = vpop.xlane.xlu2 %390  ;;  %v990_v10 = vpop.xlane.xlu0 %398 }
 0x128   : > { %v414_v11 = vsub.f32 %v900_v30, %v988_v9  ;;  %v418_v12 = vsub.f32 %v904_v31, %v990_v10 }
 0x12a   : > { %v747_v13 = vpop.eup %746  ;;  %v438_v14 = vmul.f32 1.442695, %v414_v11  ;;  %v446_v15 = vmul.f32 1.442695, %v418_v12 }
 0x12b   : > { %v749_v16 = vpop.eup %748  ;;  %462 = vadd.xlane.f32.xlu2 %v747_v13 }
 0x12c   : > { %750 = vpow2.f32 %v438_v14  ;;  %454 = vadd.xlane.f32.xlu1 %v749_v16 }
 0x12d   : > { %752 = vpow2.f32 %v446_v15 }
 0x12f   : > { %v996_v17 = vpop.xlane.xlu2 %384  ;;  %v998_v18 = vpop.xlane.xlu1 %378 }
 0x130   : > { %v411_v19 = vsub.f32 %v913_v39, %v996_v17  ;;  %v1002_v20 = vpop.xlane.xlu0 %376  ;;  %v408_v27 = vsub.f32 %v917_v40, %v998_v18 }
 0x131   : > { %v407_v21 = vsub.f32 %v923_v41, %v1002_v20 }
 0x132   : > { %v751_v22 = vpop.eup %750  ;;  %v432_v25 = vmul.f32 1.442695, %v411_v19  ;;  %v426_v29 = vmul.f32 1.442695, %v408_v27 }
 0x133   : > { %v753_v26 = vpop.eup %752  ;;  %v424_v28 = vmul.f32 1.442695, %v407_v21  ;;  %470 = vadd.xlane.f32.xlu0 %v751_v22 }
 0x134   : > { %754 = vpow2.f32 %v432_v25  ;;  %478 = vadd.xlane.f32.xlu1 %v753_v26 }
 0x135   : > { %756 = vpow2.f32 %v424_v28 }
 0x136   : > { %758 = vpow2.f32 %v426_v29 }
 0x137   : > { %v1008_v32 = vpop.xlane.xlu1 %394 }
 0x138   : > { %v416_v33 = vsub.f32 %v930_v47, %v1008_v32  ;;  %v1012_v34 = vpop.xlane.xlu0 %392 }
 0x139   : > { %v415_v35 = vsub.f32 %v935_v49, %v1012_v34 }
 0x13a   : > { %v755_v36 = vpop.eup %754  ;;  %v442_v37 = vmul.f32 1.442695, %v416_v33 }
 0x13b   : > { %v440_v38 = vmul.f32 1.442695, %v415_v35  ;;  %464 = vadd.xlane.f32.xlu0 %v755_v36  ;;  %v757_v42 = vpop.eup %756 }
 0x13c   : > { %760 = vpow2.f32 %v442_v37  ;;  %456 = vadd.xlane.f32.xlu2 %v757_v42  ;;  %v759_v48 = vpop.eup %758 }
 0x13d   : > { %762 = vpow2.f32 %v440_v38 }
 0x13e   : > { %v1016_v43 = vpop.xlane.xlu2 %396 }
 0x13f   : > { %v417_v44 = vsub.f32 %v943_v54, %v1016_v43  ;;  %v1020_v45 = vpop.xlane.xlu1 %380 }
 0x140   : > { %v1022_v46 = vpop.xlane.xlu0 %386  ;;  %v409_v58 = vsub.f32 %v952_v56, %v1020_v45 }
 0x141   : > { %v444_v50 = vmul.f32 1.442695, %v417_v44  ;;  %v412_v51 = vsub.f32 %v947_v55, %v1022_v46 }
 0x142   : > { %v761_v52 = vpop.eup %760  ;;  %v428_v5 = vmul.f32 1.442695, %v409_v58 }
 0x143   : > { %v763_v53 = vpop.eup %762  ;;  %v434_v57 = vmul.f32 1.442695, %v412_v51  ;;  %458 = vadd.xlane.f32.xlu0 %v759_v48  ;;  %764 = vpow2.f32 %v444_v50 }
 0x144   : > { %472 = vadd.xlane.f32.xlu1 %v763_v53  ;;  %474 = vadd.xlane.f32.xlu2 %v761_v52 }
 0x145   : > { %766 = vpow2.f32 %v434_v57 }
 0x146   : > { %v1028_v59 = vpop.xlane.xlu2 %402 }
 0x147   : > { %v420_v60 = vsub.f32 %v961_v62, %v1028_v59  ;;  %v1032_v61 = vpop.xlane.xlu1 %388 }
 0x148   : > { %v413_v1 = vsub.f32 %v970_v0, %v1032_v61  ;;  %v1036_v11 = vpop.xlane.xlu0 %404 }
 0x149   : > { %v450_v6 = vmul.f32 1.442695, %v420_v60  ;;  %v765_v7 = vpop.eup %764  ;;  %v421_v13 = vsub.f32 %v965_v63, %v1036_v11 }
 0x14a   : > { %v436_v8 = vmul.f32 1.442695, %v413_v1 }
 0x14b   : > { %v767_v12 = vpop.eup %766  ;;  %768 = vpow2.f32 %v450_v6  ;;  %476 = vadd.xlane.f32.xlu0 %v765_v7  ;;  %v452_v19 = vmul.f32 1.442695, %v421_v13 }
 0x14c   : > { %770 = vpow2.f32 %v436_v8  ;;  %466 = vadd.xlane.f32.xlu1 %v767_v12 }
 0x14d   : > { %772 = vpow2.f32 %v428_v5 }
 0x14f   : > { %v1040_v14 = vpop.xlane.xlu1 %400 }
 0x150   : > { %v419_v15 = vsub.f32 %v977_v2, %v1040_v14 }
 0x151   : > { %v769_v16 = vpop.eup %768 }
 0x152   : > { %v771_v21 = vpop.eup %770  ;;  %v448_v22 = vmul.f32 1.442695, %v419_v15 }
 0x153   : > { %v773_v25 = vpop.eup %772  ;;  %482 = vadd.xlane.f32.xlu0 %v769_v16  ;;  %468 = vadd.xlane.f32.xlu2 %v771_v21 }
 0x154   : > { %774 = vpow2.f32 %v448_v22  ;;  %460 = vadd.xlane.f32.xlu1 %v773_v25 }
 0x155   : > { %776 = vpow2.f32 %v452_v19 }
 0x15a   : > { %v775_v26 = vpop.eup %774 }
 0x15b   : > { %v777_v27 = vpop.eup %776  ;;  %480 = vadd.xlane.f32.xlu2 %v775_v26 }
 0x15c   : > { %484 = vadd.xlane.f32.xlu1 %v777_v27 }
 0x19e   : > { %v463_v28 = vpop.xlane.xlu2 %462 }
 0x19f   : > { %778 = vlog2.f32 %v463_v28  ;;  %v455_v29 = vpop.xlane.xlu1 %454 }
 0x1a0   : > { %780 = vlog2.f32 %v455_v29 }
 0x1a5   : > { %v779_v33 = vpop.eup %778 }
 0x1a6   : > { %v781_v35 = vpop.eup %780  ;;  %v495_v36 = vmul.f32 0.6931472, %v779_v33  ;;  %v471_v37 = vpop.xlane.xlu0 %470 }
 0x1a7   : > { %v487_v38 = vmul.f32 0.6931472, %v781_v35  ;;  %v479_v42 = vpop.xlane.xlu1 %478  ;;  %782 = vlog2.f32 %v471_v37 }
 0x1a8   : > { %v522_v44 = vadd.f32 %v495_v36, %v980_v3  ;;  %784 = vlog2.f32 %v479_v42 }
 0x1a9   : > { %v518_v48 = vadd.f32 %v487_v38, %v982_v4 }
 0x1aa   : > { %v538_v50 = vsub.f32 %v888_v23, %v522_v44 }
 0x1ab   : > { %v534_v51 = vsub.f32 %v892_v24, %v518_v48 }
 0x1ac   : > { %554 = vst [vmem:[%s1049_s14 + $0x20] sm:$0xff] %v538_v50 }
 0x1ad   : > { %v783_v52 = vpop.eup %782  ;;  %550 = vst [vmem:[%s1049_s14] sm:$0xff] %v534_v51 }
 0x1ae   : > { %v785_v3 = vpop.eup %784  ;;  %v503_v53 = vmul.f32 0.6931472, %v783_v52  ;;  %v465_v57 = vpop.xlane.xlu0 %464 }
 0x1af   : > { %v511_v58 = vmul.f32 0.6931472, %v785_v3  ;;  %786 = vlog2.f32 %v465_v57  ;;  %v457_v1 = vpop.xlane.xlu2 %456 }
 0x1b0   : > { %v526_v60 = vadd.f32 %v503_v53, %v988_v9  ;;  %788 = vlog2.f32 %v457_v1 }
 0x1b1   : > { %v530_v5 = vadd.f32 %v511_v58, %v990_v10 }
 0x1b2   : > { %v542_v23 = vsub.f32 %v900_v30, %v526_v60 }
 0x1b3   : > { %v546_v4 = vsub.f32 %v904_v31, %v530_v5 }
 0x1b4   : > { %558 = vst [vmem:[%s1049_s14 + $0x40] sm:$0xff] %v542_v23 }
 0x1b5   : > { %v787_v24 = vpop.eup %786  ;;  %562 = vst [vmem:[%s1049_s14 + $0x60] sm:$0xff] %v546_v4 }
 0x1b6   : > { %v497_v6 = vmul.f32 0.6931472, %v787_v24  ;;  %v459_v7 = vpop.xlane.xlu0 %458  ;;  %v789_v8 = vpop.eup %788 }
 0x1b7   : > { %v473_v12 = vpop.xlane.xlu1 %472  ;;  %790 = vlog2.f32 %v459_v7  ;;  %v489_v13 = vmul.f32 0.6931472, %v789_v8  ;;  %v475_v15 = vpop.xlane.xlu2 %474 }
 0x1b8   : > { %v523_v9 = vadd.f32 %v497_v6, %v996_v17  ;;  %792 = vlog2.f32 %v473_v12 }
 0x1b9   : > { %794 = vlog2.f32 %v475_v15  ;;  %v519_v30 = vadd.f32 %v489_v13, %v1002_v20 }
 0x1ba   : > { %v539_v31 = vsub.f32 %v913_v39, %v523_v9 }
 0x1bb   : > { %v535_v10 = vsub.f32 %v923_v41, %v519_v30 }
 0x1bc   : > { %555 = vst [vmem:[%s1049_s14 + $0x28] sm:$0xff] %v539_v31 }
 0x1bd   : > { %v791_v16 = vpop.eup %790  ;;  %551 = vst [vmem:[%s1049_s14 + $0x8] sm:$0xff] %v535_v10 }
 0x1be   : > { %v793_v19 = vpop.eup %792  ;;  %v491_v21 = vmul.f32 0.6931472, %v791_v16  ;;  %v477_v22 = vpop.xlane.xlu0 %476 }
 0x1bf   : > { %v795_v25 = vpop.eup %794  ;;  %v505_v17 = vmul.f32 0.6931472, %v793_v19  ;;  %v467_v26 = vpop.xlane.xlu1 %466  ;;  %796 = vlog2.f32 %v477_v22 }
 0x1c0   : > { %v507_v27 = vmul.f32 0.6931472, %v795_v25  ;;  %v520_v20 = vadd.f32 %v491_v21, %v998_v18  ;;  %798 = vlog2.f32 %v467_v26 }
 0x1c1   : > { %v527_v39 = vadd.f32 %v505_v17, %v1012_v34 }
 0x1c2   : > { %v528_v41 = vadd.f32 %v507_v27, %v1008_v32  ;;  %v536_v28 = vsub.f32 %v917_v40, %v520_v20 }
 0x1c3   : > { %v543_v29 = vsub.f32 %v935_v49, %v527_v39 }
 0x1c4   : > { %v544_v33 = vsub.f32 %v930_v47, %v528_v41  ;;  %552 = vst [vmem:[%s1049_s14 + $0x10] sm:$0xff] %v536_v28 }
 0x1c5   : > { %v797_v35 = vpop.eup %796  ;;  %559 = vst [vmem:[%s1049_s14 + $0x48] sm:$0xff] %v543_v29 }
 0x1c6   : > { %v799_v36 = vpop.eup %798  ;;  %560 = vst [vmem:[%s1049_s14 + $0x50] sm:$0xff] %v544_v33  ;;  %v509_v37 = vmul.f32 0.6931472, %v797_v35  ;;  %v469_v18 = vpop.xlane.xlu2 %468 }
 0x1c7   : > { %v483_v38 = vpop.xlane.xlu0 %482  ;;  %v499_v42 = vmul.f32 0.6931472, %v799_v36  ;;  %800 = vlog2.f32 %v469_v18  ;;  %v461_v34 = vpop.xlane.xlu1 %460 }
 0x1c8   : > { %v529_v32 = vadd.f32 %v509_v37, %v1016_v43  ;;  %802 = vlog2.f32 %v461_v34 }
 0x1c9   : > { %v524_v40 = vadd.f32 %v499_v42, %v1022_v46  ;;  %804 = vlog2.f32 %v483_v38 }
 0x1ca   : > { %v545_v47 = vsub.f32 %v943_v54, %v529_v32 }
 0x1cb   : > { %v540_v49 = vsub.f32 %v947_v55, %v524_v40 }
 0x1cc   : > { %561 = vst [vmem:[%s1049_s14 + $0x58] sm:$0xff] %v545_v47 }
 0x1cd   : > { %v801_v44 = vpop.eup %800  ;;  %556 = vst [vmem:[%s1049_s14 + $0x30] sm:$0xff] %v540_v49 }
 0x1ce   : > { %v803_v48 = vpop.eup %802  ;;  %v501_v50 = vmul.f32 0.6931472, %v801_v44  ;;  %v481_v51 = vpop.xlane.xlu2 %480 }
 0x1cf   : > { %v805_v52 = vpop.eup %804  ;;  %v493_v3 = vmul.f32 0.6931472, %v803_v48  ;;  %806 = vlog2.f32 %v481_v51  ;;  %v485_v43 = vpop.xlane.xlu1 %484 }
 0x1d0   : > { %v525_v46 = vadd.f32 %v501_v50, %v1032_v61  ;;  %v515_v53 = vmul.f32 0.6931472, %v805_v52  ;;  %808 = vlog2.f32 %v485_v43 }
 0x1d1   : > { %v521_v54 = vadd.f32 %v493_v3, %v1020_v45 }
 0x1d2   : > { %v541_v55 = vsub.f32 %v970_v0, %v525_v46  ;;  %v532_v57 = vadd.f32 %v515_v53, %v1028_v59 }
 0x1d3   : > { %v537_v58 = vsub.f32 %v952_v56, %v521_v54 }
 0x1d4   : > { %557 = vst [vmem:[%s1049_s14 + $0x38] sm:$0xff] %v541_v55  ;;  %v548_v60 = vsub.f32 %v961_v62, %v532_v57 }
 0x1d5   : > { %v807_v1 = vpop.eup %806  ;;  %553 = vst [vmem:[%s1049_s14 + $0x18] sm:$0xff] %v537_v58 }
 0x1d6   : > { %v809_v5 = vpop.eup %808  ;;  %564 = vst [vmem:[%s1049_s14 + $0x70] sm:$0xff] %v548_v60  ;;  %v513_v61 = vmul.f32 0.6931472, %v807_v1 }
 0x1d7   : > { %v517_v23 = vmul.f32 0.6931472, %v809_v5 }
 0x1d8   : > { %v531_v4 = vadd.f32 %v513_v61, %v1040_v14 }
 0x1d9   : > { %v533_v45 = vadd.f32 %v517_v23, %v1036_v11 }
 0x1da   : > { %v547_v0 = vsub.f32 %v977_v2, %v531_v4 }
 0x1db   : > { %v549_v24 = vsub.f32 %v965_v63, %v533_v45 }
 0x1dc   : > { %563 = vst [vmem:[%s1049_s14 + $0x68] sm:$0xff] %v547_v0 }
 0x1dd   : > { %565 = vst [vmem:[%s1049_s14 + $0x78] sm:$0xff] %v549_v24 }
 0x1de PF: > { %s13_s12 = sadd.s32 1, %s816_s12  }
 0x1df   : > { %p10_p4 = scmp.ge.s32.totalorder %s13_s12, 4  }
 0x1e1   :  { %12 = sbr.rel (!%p10_p4) target bundleno = 1 (0x1), region = 62 }

// kernel: gcnii_forward.4
= control target key start
LH: loop header
LB: loop body
LE: loop exit
PB: predicated region body
PF: predicated region fallthrough
CT: control target
= control target key end

     0   :  { %s2025_s0 = inlined_call_operand.vmem [shape: bf16[256,256], index: 0, kind: input, shape index: {}]   ;;  %s2026_s1 = inlined_call_operand.vmem [shape: f32[256,128], index: 1, kind: input, shape index: {}]   ;;  %s2027_s2 = inlined_call_operand.vmem [shape: bf16[4,128,128], index: 2, kind: input, shape index: {}]   ;;  %s2028_s3 = inlined_call_operand.vmem [shape: f32[4,1,128], index: 3, kind: input, shape index: {}]   ;;  %s2029_s4 = inlined_call_operand.vmem [shape: bf16[256,128], index: 4, kind: output, shape index: {}]  }
   0x1   :  { %2030 = sst [smem:[#allocation5_spill]] %s2025_s0 }
   0x2   :  { %s1702_s15 = smov 0   ;;  %s1704_s16 = smov 0  }
   0x3   :  { %s1706_s17 = smov 0   ;;  %s1708_s18 = smov 0  }
   0x4   :  { %s1710_s19 = smov 0   ;;  %s1712_s20 = smov 0  }
   0x5   :  { %s1714_s21 = smov 0   ;;  %s1716_s22 = smov 0  }
   0x6   :  { %s1718_s23 = smov 0  }
   0x7 LB: > { %s26_s24 = sadd.s32 1, %s1662_s20  ;;  %s29_s25 = sadd.s32 1, %s1666_s21  ;;  %s1674_s23 = sphi %s1718_s23, %s14_s23   ;;  %s1670_s22 = sphi %s1716_s22, %s2040_s22   ;;  %s1666_s21 = sphi %s1714_s21, %s2039_s21   ;;  %s1662_s20 = sphi %s1712_s20, %s2038_s20   ;;  %s1658_s19 = sphi %s1710_s19, %s2037_s19   ;;  %s1654_s18 = sphi %s1708_s18, %s2036_s18   ;;  %s1650_s17 = sphi %s1706_s17, %s2035_s17   ;;  %s1646_s16 = sphi %s1704_s16, %s2034_s16   ;;  %s1642_s15 = sphi %s1702_s15, %s2033_s15  }
   0x8   : > { %p27_p0 = scmp.ge.s32.totalorder %s26_s24, 2  ;;  %p49_p1 = scmp.ne.s32.totalorder %s1646_s16, %s1642_s15 }
   0x9   : > { %p50_p2 = scmp.eq.s32.totalorder %s1674_s23, 0  ;;  %s33_s26 = sadd.s32 1, %s1670_s22 }
   0xa   : > { %s2042_s24 = smov (%p27_p0, %s26_s24), 0  ;;  %s2044_s25 = smov (!%p27_p0, %s29_s25), %s1666_s21 }
   0xb   : > { %p31_p3 = scmp.ge.s32.totalorder %s2044_s25, 2  ;;  %s38_s27 = ssub.s32 %s1662_s20, %s2042_s24 }
   0xc   : > { %p51_p4 = por %p50_p2, %p49_p1  ;;  %s42_s29 = sadd.s32 1, %s1646_s16 }
   0xd   : > { %s2046_s25 = smov (%p31_p3, %s2044_s25), 0  ;;  %s2048_s26 = smov (!%p31_p3, %s33_s26), %s1670_s22 }
   0xe   : > { %s37_s28 = ssub.s32 %s1666_s21, %s2046_s25  ;;  %p35_p5 = scmp.ge.s32.totalorder %s2048_s26, 4 }
   0xf   : > { %s39_s30 = sor.u32 %s38_s27, %s37_s28  ;;  %p1141_p7 = scmp.ge.s32.totalorder %s1674_s23, 16 }
  0x10   : > { %p40_p6 = scmp.eq.s32.totalorder %s39_s30, 0  ;;  %s2050_s26 = smov (%p35_p5, %s2048_s26), 0 }
  0x11   : > { %177 = sbr.rel (%p1141_p7) target bundleno = 48 (0x30), region = 20 }
  0x12   : > { %s1767_s5 = scalar_select %p40_p6, %s1646_s16, %s42_s29  }
  0x16   : > { %180 = sbr.rel (!%p51_p4) target bundleno = 48 (0x30), region = 24  ;;  %s182_s6 = sand.u32 (%p51_p4), 1, %s1646_s16  }
  0x17   : > { %s1266_s7 = sshll.u32 (%p51_p4), %s1666_s21, 5  ;;  %s1142_s8 = sshll.u32 (%p51_p4), %s182_s6, 6 }
  0x18   : > { %s187_s9 = sadd.s32 (%p51_p4), %s1662_s20, %s1266_s7  ;;  %s2031_s0 = sld [smem:[#allocation5_spill]] (%p51_p4) }
  0x19   : > { %s1145_s10 = sshll.u32 (%p51_p4), %s187_s9, 2  ;;  %s184_s14 = scalar_lea.vmem (%p51_p4), [#allocation4], %s1142_s8 }
  0x1e   : > { %s1776_s13 = scalar_lea.vmem %s2031_s0, %s1145_s10 }
  0x1f   : > { %v206_v0 = vld [vmem:[%s1776_s13] sm:$0xf]  ;;  %v208_v1 = vld [vmem:[%s1776_s13 + $0x8] sm:$0xf]  ;;  %v210_v2 = vld [vmem:[%s1776_s13 + $0x10] sm:$0xf] }
  0x20   : > { %207 = vst [vmem:[%s184_s14] sm:$0xf] %v206_v0  ;;  %v212_v3 = vld [vmem:[%s1776_s13 + $0x18] sm:$0xf]  ;;  %v214_v4 = vld [vmem:[%s1776_s13 + $0x20] sm:$0xf] }
  0x21   : > { %209 = vst [vmem:[%s184_s14 + $0x4] sm:$0xf] %v208_v1  ;;  %v216_v5 = vld [vmem:[%s1776_s13 + $0x28] sm:$0xf]  ;;  %v218_v6 = vld [vmem:[%s1776_s13 + $0x30] sm:$0xf] }
  0x22   : > { %211 = vst [vmem:[%s184_s14 + $0x8] sm:$0xf] %v210_v2  ;;  %v220_v7 = vld [vmem:[%s1776_s13 + $0x38] sm:$0xf]  ;;  %v222_v8 = vld [vmem:[%s1776_s13 + $0x40] sm:$0xf] }
  0x23   : > { %213 = vst [vmem:[%s184_s14 + $0xc] sm:$0xf] %v212_v3  ;;  %v224_v9 = vld [vmem:[%s1776_s13 + $0x48] sm:$0xf]  ;;  %v226_v10 = vld [vmem:[%s1776_s13 + $0x50] sm:$0xf] }
  0x24   : > { %215 = vst [vmem:[%s184_s14 + $0x10] sm:$0xf] %v214_v4  ;;  %v228_v11 = vld [vmem:[%s1776_s13 + $0x58] sm:$0xf]  ;;  %v230_v12 = vld [vmem:[%s1776_s13 + $0x60] sm:$0xf] }
  0x25   : > { %217 = vst [vmem:[%s184_s14 + $0x14] sm:$0xf] %v216_v5  ;;  %v232_v13 = vld [vmem:[%s1776_s13 + $0x68] sm:$0xf]  ;;  %v234_v14 = vld [vmem:[%s1776_s13 + $0x70] sm:$0xf] }
  0x26   : > { %219 = vst [vmem:[%s184_s14 + $0x18] sm:$0xf] %v218_v6  ;;  %v236_v15 = vld [vmem:[%s1776_s13 + $0x78] sm:$0xf] }
  0x27   : > { %221 = vst [vmem:[%s184_s14 + $0x1c] sm:$0xf] %v220_v7 }
  0x28   : > { %223 = vst [vmem:[%s184_s14 + $0x20] sm:$0xf] %v222_v8 }
  0x29   : > { %225 = vst [vmem:[%s184_s14 + $0x24] sm:$0xf] %v224_v9 }
  0x2a   : > { %227 = vst [vmem:[%s184_s14 + $0x28] sm:$0xf] %v226_v10 }
  0x2b   : > { %229 = vst [vmem:[%s184_s14 + $0x2c] sm:$0xf] %v228_v11 }
  0x2c   : > { %231 = vst [vmem:[%s184_s14 + $0x30] sm:$0xf] %v230_v12 }
  0x2d   : > { %233 = vst [vmem:[%s184_s14 + $0x34] sm:$0xf] %v232_v13 }
  0x2e   : > { %235 = vst [vmem:[%s184_s14 + $0x38] sm:$0xf] %v234_v14 }
  0x2f   : > { %237 = vst [vmem:[%s184_s14 + $0x3c] sm:$0xf] %v236_v15 }
  0x30 PF: > { %p1146_p8 = scmp.ge.s32.totalorder %s1674_s23, 1  ;;  %p306_p9 = scmp.lt.s32.totalorder %s1674_s23, 17 }
  0x32   : > { %p307_p10 = pnand %p1146_p8, %p306_p9 }
  0x33   : > { %s313_s27 = sand.u32 (!%p307_p10), 1, %s1642_s15   ;;  %p347_p11 = scmp.lt.s32.totalorder (!%p307_p10), %s1658_s19, 3 }
  0x34   : > { %310 = sbr.rel (%p307_p10) target bundleno = 521 (0x209), region = 73  ;;  %s1147_s28 = sshll.u32 (!%p307_p10), %s313_s27, 6 }
  0x35   : > { %s1150_s29 = sshll.u32 (!%p307_p10), %s1654_s18, 4  ;;  %p361_p13 = scmp.eq.s32.totalorder (!%p307_p10), %s1658_s19, 0 }
  0x36   : > { %p356_p12 = scmp.lt.s32.totalorder (!%p307_p10), %s1150_s29, 31  ;;  %p362_p0 = scmp.eq.s32.totalorder (!%p307_p10), %s1654_s18, 0 }
  0x37   : > { %p365_p2 = scmp.eq.s32.totalorder (!%p307_p10), %s1650_s17, 0  ;;  %s1820_s0 = scalar_lea.vmem (!%p307_p10), [#allocation4], %s1147_s28 }
  0x38   : > { %p363_p1 = pnand (!%p307_p10), %p362_p0, %p361_p13 }
  0x39   : > { %s1800_s30 = scalar_select %p347_p11, %s1658_s19, 3 }
  0x3a   : > { %s2052_s29 = smov (!%p356_p12, %s1150_s29), 31  ;;  %p364_p3 = pneg %p363_p1 }
  0x3b   : > { %s1267_s6 = sshll.u32 %s1800_s30, 6  ;;  %s1151_s15 = sshll.u32 %s2052_s29, 2 }
  0x3c   : > { %s1810_s12 = scalar_lea.vmem %s2027_s2, %s1267_s6  ;;  %s1815_s27 = scalar_lea.vmem %s2029_s4, %s1151_s15 }
  0x3d   : > { %p366_p4 = pnand %p365_p2, %p364_p3 }
  0x3f   : > { %369 = sbr.rel (%p366_p4) target bundleno = 87 (0x57), region = 81 }
  0x44   : > { %v370_v16 = vld [vmem:[%s2026_s1] sm:$0xff]  ;;  %v371_v17 = vld [vmem:[%s2026_s1 + $0x8] sm:$0xff]  ;;  %v372_v18 = vld [vmem:[%s2026_s1 + $0x10] sm:$0xff] }
  0x45   : > { %v1297_v19 = vpack.c.bf16 %v371_v17, %v370_v16  ;;  %v373_v20 = vld [vmem:[%s2026_s1 + $0x18] sm:$0xff]  ;;  %v374_v21 = vld [vmem:[%s2026_s1 + $0x20] sm:$0xff]  ;;  %v375_v22 = vld [vmem:[%s2026_s1 + $0x28] sm:$0xff] }
  0x46   : > { %v1302_v23 = vpack.c.bf16 %v373_v20, %v372_v18  ;;  %v1307_v24 = vpack.c.bf16 %v375_v22, %v374_v21  ;;  %v376_v25 = vld [vmem:[%s2026_s1 + $0x30] sm:$0xff]  ;;  %v377_v26 = vld [vmem:[%s2026_s1 + $0x38] sm:$0xff]  ;;  %v378_v27 = vld [vmem:[%s2026_s1 + $0x40] sm:$0xff] }
  0x47   : > { %1298 = vst [vmem:[#allocation3] sm:$0xff] %v1297_v19   ;;  %v1312_v28 = vpack.c.bf16 %v377_v26, %v376_v25  ;;  %v379_v29 = vld [vmem:[%s2026_s1 + $0x48] sm:$0xff]  ;;  %v380_v30 = vld [vmem:[%s2026_s1 + $0x50] sm:$0xff]  ;;  %v381_v31 = vld [vmem:[%s2026_s1 + $0x58] sm:$0xff] }
  0x48   : > { %1454 = vst [vmem:[#allocation3 + $0x8] sm:$0xff] %v1302_v23   ;;  %v1317_v32 = vpack.c.bf16 %v379_v29, %v378_v27  ;;  %v1322_v33 = vpack.c.bf16 %v381_v31, %v380_v30  ;;  %v382_v34 = vld [vmem:[%s2026_s1 + $0x60] sm:$0xff]  ;;  %v383_v35 = vld [vmem:[%s2026_s1 + $0x68] sm:$0xff]  ;;  %v384_v36 = vld [vmem:[%s2026_s1 + $0x70] sm:$0xff] }
  0x49   : > { %1455 = vst [vmem:[#allocation3 + $0x10] sm:$0xff] %v1307_v24   ;;  %v1327_v37 = vpack.c.bf16 %v383_v35, %v382_v34  ;;  %v385_v38 = vld [vmem:[%s2026_s1 + $0x78] sm:$0xff]  ;;  %v418_v39 = vld [vmem:[%s2026_s1 + $0x80] sm:$0xff]  ;;  %v419_v40 = vld [vmem:[%s2026_s1 + $0x88] sm:$0xff] }
  0x4a   : > { %1456 = vst [vmem:[#allocation3 + $0x18] sm:$0xff] %v1312_v28   ;;  %v1332_v41 = vpack.c.bf16 %v385_v38, %v384_v36  ;;  %v420_v42 = vld [vmem:[%s2026_s1 + $0x90] sm:$0xff]  ;;  %v421_v43 = vld [vmem:[%s2026_s1 + $0x98] sm:$0xff]  ;;  %v422_v44 = vld [vmem:[%s2026_s1 + $0xa0] sm:$0xff]  ;;  %v1337_v45 = vpack.c.bf16 %v419_v40, %v418_v39 }
  0x4b   : > { %1457 = vst [vmem:[#allocation3 + $0x20] sm:$0xff] %v1317_v32   ;;  %v423_v46 = vld [vmem:[%s2026_s1 + $0xa8] sm:$0xff]  ;;  %v424_v47 = vld [vmem:[%s2026_s1 + $0xb0] sm:$0xff]  ;;  %v425_v48 = vld [vmem:[%s2026_s1 + $0xb8] sm:$0xff]  ;;  %v1342_v49 = vpack.c.bf16 %v421_v43, %v420_v42 }
  0x4c   : > { %1458 = vst [vmem:[#allocation3 + $0x28] sm:$0xff] %v1322_v33   ;;  %v426_v50 = vld [vmem:[%s2026_s1 + $0xc0] sm:$0xff]  ;;  %v427_v51 = vld [vmem:[%s2026_s1 + $0xc8] sm:$0xff]  ;;  %v1347_v52 = vpack.c.bf16 %v423_v46, %v422_v44  ;;  %v428_v53 = vld [vmem:[%s2026_s1 + $0xd0] sm:$0xff]  ;;  %v1352_v55 = vpack.c.bf16 %v425_v48, %v424_v47 }
  0x4d   : > { %1459 = vst [vmem:[#allocation3 + $0x30] sm:$0xff] %v1327_v37   ;;  %v429_v54 = vld [vmem:[%s2026_s1 + $0xd8] sm:$0xff]  ;;  %v430_v56 = vld [vmem:[%s2026_s1 + $0xe0] sm:$0xff]  ;;  %v431_v57 = vld [vmem:[%s2026_s1 + $0xe8] sm:$0xff]  ;;  %v1357_v58 = vpack.c.bf16 %v427_v51, %v426_v50 }
  0x4e   : > { %1460 = vst [vmem:[#allocation3 + $0x38] sm:$0xff] %v1332_v41   ;;  %v432_v59 = vld [vmem:[%s2026_s1 + $0xf0] sm:$0xff]  ;;  %v433_v60 = vld [vmem:[%s2026_s1 + $0xf8] sm:$0xff]  ;;  %v1362_v61 = vpack.c.bf16 %v429_v54, %v428_v53  ;;  %v1367_v62 = vpack.c.bf16 %v431_v57, %v430_v56 }
  0x4f   : > { %1338 = vst [vmem:[#allocation3 + $0x40] sm:$0xff] %v1337_v45   ;;  %v1372_v63 = vpack.c.bf16 %v433_v60, %v432_v59 }
  0x50   : > { %1461 = vst [vmem:[#allocation3 + $0x48] sm:$0xff] %v1342_v49  }
  0x51   : > { %1462 = vst [vmem:[#allocation3 + $0x50] sm:$0xff] %v1347_v52  }
  0x52   : > { %1463 = vst [vmem:[#allocation3 + $0x58] sm:$0xff] %v1352_v55  }
  0x53   : > { %1464 = vst [vmem:[#allocation3 + $0x60] sm:$0xff] %v1357_v58  }
  0x54   : > { %1465 = vst [vmem:[#allocation3 + $0x68] sm:$0xff] %v1362_v61  }
  0x55   : > { %1466 = vst [vmem:[#allocation3 + $0x70] sm:$0xff] %v1367_v62  }
  0x56   : > { %1467 = vst [vmem:[#allocation3 + $0x78] sm:$0xff] %v1372_v63  }
  0x57 PF: > { %p1152_p5 = scmp.ne.s32.totalorder %s1650_s17, 0 }
  0x59   : > { %469 = sbr.rel (%p1152_p5) target bundleno = 111 (0x6f), region = 85 }
  0x5e   : > { %v1676_v0 = vmov 0.0  }
  0x5f   : > { %470 = vst [vmem:[#allocation2 + $0x30] sm:$0xff] %v1676_v0 }
  0x60   : > { %471 = vst [vmem:[#allocation2] sm:$0xff] %v1676_v0 }
  0x61   : > { %472 = vst [vmem:[#allocation2 + $0x58] sm:$0xff] %v1676_v0 }
  0x62   : > { %473 = vst [vmem:[#allocation2 + $0x18] sm:$0xff] %v1676_v0 }
  0x63   : > { %474 = vst [vmem:[#allocation2 + $0x50] sm:$0xff] %v1676_v0 }
  0x64   : > { %475 = vst [vmem:[#allocation2 + $0x68] sm:$0xff] %v1676_v0 }
  0x65   : > { %476 = vst [vmem:[#allocation2 + $0x8] sm:$0xff] %v1676_v0 }
  0x66   : > { %477 = vst [vmem:[#allocation2 + $0x48] sm:$0xff] %v1676_v0 }
  0x67   : > { %478 = vst [vmem:[#allocation2 + $0x40] sm:$0xff] %v1676_v0 }
  0x68   : > { %479 = vst [vmem:[#allocation2 + $0x20] sm:$0xff] %v1676_v0 }
  0x69   : > { %480 = vst [vmem:[#allocation2 + $0x10] sm:$0xff] %v1676_v0 }
  0x6a   : > { %481 = vst [vmem:[#allocation2 + $0x38] sm:$0xff] %v1676_v0 }
  0x6b   : > { %482 = vst [vmem:[#allocation2 + $0x60] sm:$0xff] %v1676_v0 }
  0x6c   : > { %483 = vst [vmem:[#allocation2 + $0x70] sm:$0xff] %v1676_v0 }
  0x6d   : > { %484 = vst [vmem:[#allocation2 + $0x78] sm:$0xff] %v1676_v0 }
  0x6e   : > { %485 = vst [vmem:[#allocation2 + $0x28] sm:$0xff] %v1676_v0 }
  0x6f PF: > { %p486_p6 = scmp.lt.s32.totalorder %s1658_s19, 0  ;;  %s487_s9 = ssub.s32 0, %s1658_s19  ;;  %v1268_v9 = vld [vmem:[%s1820_s0] sm:$0xff]  ;;  %v1270_v10 = vld [vmem:[%s1820_s0 + $0x10] sm:$0xff]  ;;  %v1269_v13 = vld [vmem:[%s1820_s0 + $0x8] sm:$0xff] }
  0x70   : > { %s1153_s14 = smin.u32 %s1658_s19, %s487_s9  ;;  %v1272_v11 = vld [vmem:[%s1820_s0 + $0x20] sm:$0xff]  ;;  %v1274_v12 = vld [vmem:[%s1820_s0 + $0x30] sm:$0xff]  ;;  %v1271_v14 = vld [vmem:[%s1820_s0 + $0x18] sm:$0xff]  ;;  %p1223_p8 = scmp.ne.s32.totalorder %s1650_s17, 1 }
  0x71   : > { %s489_s7 = sand.u32 1, %s1153_s14   ;;  %v1273_v15 = vld [vmem:[%s1820_s0 + $0x28] sm:$0xff]  ;;  %v1275_v16 = vld [vmem:[%s1820_s0 + $0x38] sm:$0xff]  ;;  %v499_v17 = vld [vmem:[#allocation2 + $0x30] sm:$0xff]  ;;  %s1224_s0 = sshll.u32 (!%p1223_p8), %s1654_s18, 7 }
  0x72   : > { %s490_s8 = ssub.s32 0, %s489_s7  ;;  %v503_v18 = vld [vmem:[#allocation2 + $0x50] sm:$0xff]  ;;  %v507_v23 = vld [vmem:[#allocation2 + $0x40] sm:$0xff]  ;;  %v504_v26 = vld [vmem:[#allocation2 + $0x68] sm:$0xff]  ;;  %s1949_s28 = scalar_lea.vmem (!%p1223_p8), %s2026_s1, %s1224_s0 }
  0x73   : > { %s2054_s8 = smov (!%p486_p6, %s490_s8), %s489_s7  ;;  %v511_v24 = vld [vmem:[#allocation2 + $0x60] sm:$0xff]  ;;  %v512_v36 = vld [vmem:[#allocation2 + $0x70] sm:$0xff]  ;;  %v501_v37 = vld [vmem:[#allocation2 + $0x58] sm:$0xff]  ;;  %p1263_p11 = scmp.ne.s32.totalorder (!%p1223_p8), %s1658_s19, 3 }
  0x74   : > { %p1155_p7 = scmp.lt.s32.totalorder %s2054_s8, 0  ;;  %s496_s6 = sadd.s32 2, %s2054_s8  ;;  %v500_v25 = vld [vmem:[#allocation2] sm:$0xff]  ;;  %v505_v38 = vld [vmem:[#allocation2 + $0x8] sm:$0xff]  ;;  %v509_v47 = vld [vmem:[#allocation2 + $0x10] sm:$0xff] }
  0x75   : > { %v508_v35 = vld [vmem:[#allocation2 + $0x20] sm:$0xff]  ;;  %v513_v48 = vld [vmem:[#allocation2 + $0x78] sm:$0xff]  ;;  %v506_v50 = vld [vmem:[#allocation2 + $0x48] sm:$0xff] }
  0x76   : > { %s2056_s6 = smov (!%p1155_p7, %s496_s6), %s2054_s8  ;;  %v502_v49 = vld [vmem:[#allocation2 + $0x18] sm:$0xff]  ;;  %v514_v60 = vld [vmem:[#allocation2 + $0x28] sm:$0xff] }
  0x77   : > { %s1156_s29 = sshll.u32 %s2056_s6, 1  ;;  %v510_v59 = vld [vmem:[#allocation2 + $0x38] sm:$0xff] }
  0x78   : > { %s531_s10 = sadd.s32 %s1650_s17, %s1156_s29 }
  0x79   : > { %s1276_s11 = sshll.u32 %s531_s10, 6 }
  0x7a   : > { %s1923_s15 = scalar_lea.vmem [#allocation3], %s1276_s11  ;;  %s2032_s11 = scalar_lea.vmem (!%p1223_p8), %s2028_s3, %s1800_s30 }
  0x7b   : > { %v1284_v1 = vld [vmem:[%s1923_s15 + $0x38] sm:$0xff]  ;;  %v1283_v2 = vld [vmem:[%s1923_s15 + $0x30] sm:$0xff]  ;;  %v1282_v3 = vld [vmem:[%s1923_s15 + $0x28] sm:$0xff] }
  0x7c   : > { %647 = vmatpush.bf16.msra.mxu0 %v1284_v1  ;;  %1482 = vmatpush.bf16.msra.mxu1 %v1284_v1  ;;  %v1281_v4 = vld [vmem:[%s1923_s15 + $0x20] sm:$0xff]  ;;  %v1280_v5 = vld [vmem:[%s1923_s15 + $0x18] sm:$0xff]  ;;  %v1279_v6 = vld [vmem:[%s1923_s15 + $0x10] sm:$0xff] }
  0x7d   : > { %1483 = vmatpush.bf16.msra.mxu2 %v1284_v1  ;;  %1484 = vmatpush.bf16.msra.mxu3 %v1284_v1  ;;  %v1278_v7 = vld [vmem:[%s1923_s15 + $0x8] sm:$0xff]  ;;  %v1277_v8 = vld [vmem:[%s1923_s15] sm:$0xff] }
  0x80   : > { %648 = vmatpush.bf16.msra.mxu0 %v1283_v2  ;;  %1485 = vmatpush.bf16.msra.mxu1 %v1283_v2 }
  0x81   : > { %1486 = vmatpush.bf16.msra.mxu2 %v1283_v2  ;;  %1487 = vmatpush.bf16.msra.mxu3 %v1283_v2 }
  0x84   : > { %649 = vmatpush.bf16.msra.mxu0 %v1282_v3  ;;  %1488 = vmatpush.bf16.msra.mxu1 %v1282_v3 }
  0x85   : > { %1489 = vmatpush.bf16.msra.mxu2 %v1282_v3  ;;  %1490 = vmatpush.bf16.msra.mxu3 %v1282_v3 }
  0x88   : > { %650 = vmatpush.bf16.msra.mxu0 %v1281_v4  ;;  %1491 = vmatpush.bf16.msra.mxu1 %v1281_v4 }
  0x89   : > { %1492 = vmatpush.bf16.msra.mxu2 %v1281_v4  ;;  %1493 = vmatpush.bf16.msra.mxu3 %v1281_v4 }
  0x8c   : > { %651 = vmatpush.bf16.msra.mxu0 %v1280_v5  ;;  %1494 = vmatpush.bf16.msra.mxu1 %v1280_v5 }
  0x8d   : > { %1495 = vmatpush.bf16.msra.mxu2 %v1280_v5  ;;  %1496 = vmatpush.bf16.msra.mxu3 %v1280_v5 }
  0x90   : > { %652 = vmatpush.bf16.msra.mxu0 %v1279_v6  ;;  %1497 = vmatpush.bf16.msra.mxu1 %v1279_v6 }
  0x91   : > { %1498 = vmatpush.bf16.msra.mxu2 %v1279_v6  ;;  %1499 = vmatpush.bf16.msra.mxu3 %v1279_v6 }
  0x94   : > { %653 = vmatpush.bf16.msra.mxu0 %v1278_v7  ;;  %1500 = vmatpush.bf16.msra.mxu1 %v1278_v7 }
  0x95   : > { %1501 = vmatpush.bf16.msra.mxu2 %v1278_v7  ;;  %1502 = vmatpush.bf16.msra.mxu3 %v1278_v7 }
  0x98   : > { %654 = vmatpush.bf16.msra.mxu0 %v1277_v8  ;;  %1503 = vmatpush.bf16.msra.mxu1 %v1277_v8 }
  0x99   : > { %1504 = vmatpush.bf16.msra.mxu2 %v1277_v8  ;;  %1505 = vmatpush.bf16.msra.mxu3 %v1277_v8 }
  0x9b   : > { %655 = vmatmul.bf16.vlgmr.msra.gmra.mxu0 %v1268_v9  ;;  %665 = vmatmul.bf16.vlgmr.msra.gmra.mxu1 %v1270_v10 }
  0x9c   : > { %675 = vmatmul.bf16.vlgmr.msra.gmra.mxu2 %v1272_v11  ;;  %685 = vmatmul.bf16.vlgmr.msra.gmra.mxu3 %v1274_v12 }
  0xab   : > { %660 = vmatmul.bf16.gmra.mxu0 %v1269_v13  ;;  %670 = vmatmul.bf16.gmra.mxu1 %v1271_v14 }
  0xac   : > { %680 = vmatmul.bf16.gmra.mxu2 %v1273_v15  ;;  %690 = vmatmul.bf16.gmra.mxu3 %v1275_v16 }
 0x118   : > { %v656_v19 = vpop.f32.mrf.mxu0  ;;  %v666_v20 = vpop.f32.mrf.mxu1 }
 0x119   : > { %v696_v21 = vadd.f32 %v656_v19, %v499_v17  ;;  %v700_v22 = vadd.f32 %v666_v20, %v503_v18 }
 0x11b   : > { %712 = vst [vmem:[#allocation2 + $0x30] sm:$0xff] %v696_v21 }
 0x11c   : > { %716 = vst [vmem:[#allocation2 + $0x50] sm:$0xff] %v700_v22 }
 0x11f   : > { %v676_v27 = vpop.f32.mrf.mxu2  ;;  %v686_v28 = vpop.f32.mrf.mxu3 }
 0x120   : > { %v704_v29 = vadd.f32 %v676_v27, %v507_v23  ;;  %v708_v30 = vadd.f32 %v686_v28, %v511_v24  ;;  %v658_v31 = vpop.f32.mrf.mxu0  ;;  %v668_v32 = vpop.f32.mrf.mxu1 }
 0x121   : > { %v697_v33 = vadd.f32 %v658_v31, %v500_v25  ;;  %v701_v34 = vadd.f32 %v668_v32, %v504_v26 }
 0x122   : > { %720 = vst [vmem:[#allocation2 + $0x40] sm:$0xff] %v704_v29 }
 0x123   : > { %724 = vst [vmem:[#allocation2 + $0x60] sm:$0xff] %v708_v30 }
 0x124   : > { %713 = vst [vmem:[#allocation2] sm:$0xff] %v697_v33 }
 0x125   : > { %717 = vst [vmem:[#allocation2 + $0x68] sm:$0xff] %v701_v34 }
 0x127   : > { %v678_v39 = vpop.f32.mrf.mxu2  ;;  %v688_v40 = vpop.f32.mrf.mxu3 }
 0x128   : > { %v705_v41 = vadd.f32 %v678_v39, %v508_v35  ;;  %v709_v42 = vadd.f32 %v688_v40, %v512_v36  ;;  %v661_v43 = vpop.f32.mrf.mxu0  ;;  %v671_v44 = vpop.f32.mrf.mxu1 }
 0x129   : > { %v698_v45 = vadd.f32 %v661_v43, %v501_v37  ;;  %v702_v46 = vadd.f32 %v671_v44, %v505_v38 }
 0x12a   : > { %721 = vst [vmem:[#allocation2 + $0x20] sm:$0xff] %v705_v41 }
 0x12b   : > { %725 = vst [vmem:[#allocation2 + $0x70] sm:$0xff] %v709_v42 }
 0x12c   : > { %714 = vst [vmem:[#allocation2 + $0x58] sm:$0xff] %v698_v45 }
 0x12d   : > { %718 = vst [vmem:[#allocation2 + $0x8] sm:$0xff] %v702_v46 }
 0x12f   : > { %v681_v51 = vpop.f32.mrf.mxu2  ;;  %v691_v52 = vpop.f32.mrf.mxu3 }
 0x130   : > { %v706_v53 = vadd.f32 %v681_v51, %v509_v47  ;;  %v710_v54 = vadd.f32 %v691_v52, %v513_v48  ;;  %v663_v55 = vpop.f32.mrf.mxu0  ;;  %v673_v56 = vpop.f32.mrf.mxu1 }
 0x131   : > { %v699_v57 = vadd.f32 %v663_v55, %v502_v49  ;;  %v703_v58 = vadd.f32 %v673_v56, %v506_v50 }
 0x132   : > { %722 = vst [vmem:[#allocation2 + $0x10] sm:$0xff] %v706_v53 }
 0x133   : > { %726 = vst [vmem:[#allocation2 + $0x78] sm:$0xff] %v710_v54 }
 0x134   : > { %715 = vst [vmem:[#allocation2 + $0x18] sm:$0xff] %v699_v57 }
 0x135   : > { %719 = vst [vmem:[#allocation2 + $0x48] sm:$0xff] %v703_v58 }
 0x137   : > { %v683_v61 = vpop.f32.mrf.mxu2  ;;  %v693_v62 = vpop.f32.mrf.mxu3  ;;  %731 = sbr.rel (%p1223_p8) target bundleno = 521 (0x209), region = 89 }
 0x138   : > { %v707_v63 = vadd.f32 %v683_v61, %v510_v59  ;;  %v711_v0 = vadd.f32 %v693_v62, %v514_v60 }
 0x13a   : > { %723 = vst [vmem:[#allocation2 + $0x38] sm:$0xff] %v707_v63 }
 0x13b   : > { %727 = vst [vmem:[#allocation2 + $0x28] sm:$0xff] %v711_v0 }
 0x13c   : > { %v1292_v1 = vld [vmem:[%s1810_s12 + $0x38] sm:$0xff]  ;;  %v1291_v2 = vld [vmem:[%s1810_s12 + $0x30] sm:$0xff]  ;;  %v1290_v3 = vld [vmem:[%s1810_s12 + $0x28] sm:$0xff] }
 0x13d   : > { %890 = vmatpush.bf16.msra.mxu0 %v1292_v1  ;;  %1506 = vmatpush.bf16.msra.mxu1 %v1292_v1  ;;  %v1289_v4 = vld [vmem:[%s1810_s12 + $0x20] sm:$0xff]  ;;  %v750_v6 = vld [vmem:[#allocation2 + $0x30] sm:$0xff]  ;;  %v735_v7 = vld [vmem:[%s1949_s28 + $0x8] sm:$0xff] }
 0x13e   : > { %1507 = vmatpush.bf16.msra.mxu2 %v1292_v1  ;;  %1508 = vmatpush.bf16.msra.mxu3 %v1292_v1  ;;  %v734_v5 = vld [vmem:[%s1949_s28] sm:$0xff]  ;;  %v1288_v9 = vld [vmem:[%s1810_s12 + $0x18] sm:$0xff]  ;;  %v754_v10 = vld [vmem:[#allocation2 + $0x50] sm:$0xff]  ;;  %v766_v11 = vmul.f32 0.9, %v750_v6 }
 0x13f   : > { %v751_v8 = vld [vmem:[#allocation2] sm:$0xff]  ;;  %v782_v12 = vmul.f32 0.1, %v734_v5  ;;  %v1287_v14 = vld [vmem:[%s1810_s12 + $0x10] sm:$0xff]  ;;  %v783_v16 = vmul.f32 0.1, %v735_v7 }
 0x140   : > { %v738_v13 = vld [vmem:[%s1949_s28 + $0x20] sm:$0xff]  ;;  %v767_v15 = vmul.f32 0.9, %v751_v8  ;;  %v739_v17 = vld [vmem:[%s1949_s28 + $0x28] sm:$0xff]  ;;  %v770_v19 = vmul.f32 0.9, %v754_v10 }
 0x141   : > { %891 = vmatpush.bf16.msra.mxu0 %v1291_v2  ;;  %1509 = vmatpush.bf16.msra.mxu1 %v1291_v2  ;;  %v755_v18 = vld [vmem:[#allocation2 + $0x68] sm:$0xff]  ;;  %v742_v20 = vld [vmem:[%s1949_s28 + $0x40] sm:$0xff]  ;;  %v786_v23 = vmul.f32 0.1, %v738_v13  ;;  %v763_v29 = vld [vmem:[#allocation2 + $0x70] sm:$0xff]  ;;  %v798_v40 = vadd.f32 %v782_v12, %v766_v11 }
 0x142   : > { %1510 = vmatpush.bf16.msra.mxu2 %v1291_v2  ;;  %1511 = vmatpush.bf16.msra.mxu3 %v1291_v2  ;;  %v743_v21 = vld [vmem:[%s1949_s28 + $0x48] sm:$0xff]  ;;  %v758_v22 = vld [vmem:[#allocation2 + $0x40] sm:$0xff]  ;;  %v771_v27 = vmul.f32 0.9, %v755_v18  ;;  %v787_v31 = vmul.f32 0.1, %v739_v17  ;;  %v799_v41 = vadd.f32 %v783_v16, %v767_v15 }
 0x143   : > { %v759_v24 = vld [vmem:[#allocation2 + $0x20] sm:$0xff]  ;;  %v747_v28 = vld [vmem:[%s1949_s28 + $0x68] sm:$0xff]  ;;  %v774_v32 = vmul.f32 0.9, %v758_v22  ;;  %v790_v33 = vmul.f32 0.1, %v742_v20  ;;  %v802_v42 = vadd.f32 %v786_v23, %v770_v19 }
 0x144   : > { %v746_v25 = vld [vmem:[%s1949_s28 + $0x60] sm:$0xff]  ;;  %v1286_v30 = vld [vmem:[%s1810_s12 + $0x8] sm:$0xff]  ;;  %v775_v34 = vmul.f32 0.9, %v759_v24  ;;  %v791_v35 = vmul.f32 0.1, %v743_v21  ;;  %v803_v43 = vadd.f32 %v787_v31, %v771_v27  ;;  %v814_v51 = vpack.c.bf16 %v799_v41, %v798_v40 }
 0x145   : > { %892 = vmatpush.bf16.msra.mxu0 %v1290_v3  ;;  %1512 = vmatpush.bf16.msra.mxu1 %v1290_v3  ;;  %v762_v26 = vld [vmem:[#allocation2 + $0x60] sm:$0xff]  ;;  %v779_v37 = vmul.f32 0.9, %v763_v29  ;;  %v794_v38 = vmul.f32 0.1, %v746_v25  ;;  %v806_v44 = vadd.f32 %v790_v33, %v774_v32  ;;  %v736_v49 = vld [vmem:[%s1949_s28 + $0x10] sm:$0xff] }
 0x146   : > { %1513 = vmatpush.bf16.msra.mxu2 %v1290_v3  ;;  %1514 = vmatpush.bf16.msra.mxu3 %v1290_v3  ;;  %v778_v36 = vmul.f32 0.9, %v762_v26  ;;  %v795_v39 = vmul.f32 0.1, %v747_v28  ;;  %v1285_v45 = vld [vmem:[%s1810_s12] sm:$0xff]  ;;  %v807_v46 = vadd.f32 %v791_v35, %v775_v34  ;;  %v752_v50 = vld [vmem:[#allocation2 + $0x58] sm:$0xff]  ;;  %v816_v52 = vpack.c.bf16 %v803_v43, %v802_v42 }
 0x147   : > { %v737_v53 = vld [vmem:[%s1949_s28 + $0x18] sm:$0xff]  ;;  %v756_v57 = vld [vmem:[#allocation2 + $0x8] sm:$0xff]  ;;  %v768_v58 = vmul.f32 0.9, %v752_v50  ;;  %v784_v59 = vmul.f32 0.1, %v736_v49 }
 0x148   : > { %v810_v47 = vadd.f32 %v794_v38, %v778_v36  ;;  %v811_v48 = vadd.f32 %v795_v39, %v779_v37  ;;  %v753_v54 = vld [vmem:[#allocation2 + $0x18] sm:$0xff]  ;;  %v818_v55 = vpack.c.bf16 %v807_v46, %v806_v44  ;;  %v740_v60 = vld [vmem:[%s1949_s28 + $0x30] sm:$0xff]  ;;  %v785_v62 = vmul.f32 0.1, %v737_v53  ;;  %v757_v63 = vld [vmem:[#allocation2 + $0x48] sm:$0xff]  ;;  %s971_s12 = sadd.s32 1, %s1658_s19 }
 0x149   : > { %893 = vmatpush.bf16.msra.mxu0 %v1289_v4  ;;  %1515 = vmatpush.bf16.msra.mxu1 %v1289_v4  ;;  %v769_v61 = vmul.f32 0.9, %v753_v54  ;;  %v741_v0 = vld [vmem:[%s1949_s28 + $0x38] sm:$0xff]  ;;  %v772_v1 = vmul.f32 0.9, %v756_v57  ;;  %v744_v2 = vld [vmem:[%s1949_s28 + $0x50] sm:$0xff]  ;;  %v800_v21 = vadd.f32 %v784_v59, %v768_v58 }
 0x14a   : > { %1516 = vmatpush.bf16.msra.mxu2 %v1289_v4  ;;  %1517 = vmatpush.bf16.msra.mxu3 %v1289_v4  ;;  %v820_v56 = vpack.c.bf16 %v811_v48, %v810_v47  ;;  %v760_v3 = vld [vmem:[#allocation2 + $0x10] sm:$0xff]  ;;  %v788_v4 = vmul.f32 0.1, %v740_v60  ;;  %v745_v5 = vld [vmem:[%s1949_s28 + $0x58] sm:$0xff]  ;;  %v773_v8 = vmul.f32 0.9, %v757_v63 }
 0x14b   : > { %v761_v6 = vld [vmem:[#allocation2 + $0x38] sm:$0xff]  ;;  %v765_v11 = vld [vmem:[#allocation2 + $0x28] sm:$0xff]  ;;  %v789_v12 = vmul.f32 0.1, %v741_v0  ;;  %v776_v13 = vmul.f32 0.9, %v760_v3  ;;  %v801_v22 = vadd.f32 %v785_v62, %v769_v61 }
 0x14c   : > { %v764_v7 = vld [vmem:[#allocation2 + $0x78] sm:$0xff]  ;;  %v777_v15 = vmul.f32 0.9, %v761_v6  ;;  %v793_v16 = vmul.f32 0.1, %v745_v5  ;;  %v804_v23 = vadd.f32 %v788_v4, %v772_v1  ;;  %s973_s9 = ssub.s32 0, %s971_s12 }
 0x14d   : > { %894 = vmatpush.bf16.msra.mxu0 %v1288_v9  ;;  %1518 = vmatpush.bf16.msra.mxu1 %v1288_v9  ;;  %v749_v10 = vld [vmem:[%s1949_s28 + $0x78] sm:$0xff]  ;;  %v780_v17 = vmul.f32 0.9, %v764_v7  ;;  %v781_v18 = vmul.f32 0.9, %v765_v11  ;;  %v805_v24 = vadd.f32 %v789_v12, %v773_v8  ;;  %v815_v29 = vpack.c.bf16 %v801_v22, %v800_v21  ;;  %s1257_s14 = smin.u32 %s973_s9, %s971_s12  ;;  %p972_p9 = scmp.lt.s32.totalorder %s971_s12, 0 }
 0x14e   : > { %1519 = vmatpush.bf16.msra.mxu2 %v1288_v9  ;;  %1520 = vmatpush.bf16.msra.mxu3 %v1288_v9  ;;  %v748_v9 = vld [vmem:[%s1949_s28 + $0x70] sm:$0xff]  ;;  %v797_v20 = vmul.f32 0.1, %v749_v10  ;;  %v809_v26 = vadd.f32 %v793_v16, %v777_v15  ;;  %s975_s7 = sand.u32 1, %s1257_s14   ;;  %v1603_v35 = vld [vmem:[%s2032_s11] ss:$0 sm:$0xff] }
 0x14f   : > { %v796_v19 = vmul.f32 0.1, %v748_v9  ;;  %s976_s8 = ssub.s32 0, %s975_s7 }
 0x150   : > { %v813_v28 = vadd.f32 %v797_v20, %v781_v18  ;;  %s2058_s8 = smov (!%p972_p9, %s976_s8), %s975_s7 }
 0x151   : > { %895 = vmatpush.bf16.msra.mxu0 %v1287_v14  ;;  %1521 = vmatpush.bf16.msra.mxu1 %v1287_v14  ;;  %v812_v27 = vadd.f32 %v796_v19, %v780_v17  ;;  %p1259_p10 = scmp.lt.s32.totalorder %s2058_s8, 0  ;;  %s982_s6 = sadd.s32 2, %s2058_s8 }
 0x152   : > { %1522 = vmatpush.bf16.msra.mxu2 %v1287_v14  ;;  %1523 = vmatpush.bf16.msra.mxu3 %v1287_v14  ;;  %v792_v14 = vmul.f32 0.1, %v744_v2 }
 0x153   : > { %v821_v32 = vpack.c.bf16 %v813_v28, %v812_v27  ;;  %s2060_s6 = smov (!%p1259_p10, %s982_s6), %s2058_s8 }
 0x154   : > { %v808_v25 = vadd.f32 %v792_v14, %v776_v13  ;;  %s1260_s15 = sshll.u32 %s2060_s6, 1 }
 0x155   : > { %896 = vmatpush.bf16.msra.mxu0 %v1286_v30  ;;  %1524 = vmatpush.bf16.msra.mxu1 %v1286_v30  ;;  %s985_s0 = sadd.s32 %s1654_s18, %s1260_s15 }
 0x156   : > { %1525 = vmatpush.bf16.msra.mxu2 %v1286_v30  ;;  %1526 = vmatpush.bf16.msra.mxu3 %v1286_v30  ;;  %v817_v30 = vpack.c.bf16 %v805_v24, %v804_v23  ;;  %v819_v31 = vpack.c.bf16 %v809_v26, %v808_v25  ;;  %s1293_s17 = sshll.u32 %s985_s0, 6 }
 0x157   : > { %s1979_s30 = scalar_lea.vmem [#allocation3], %s1293_s17 }
 0x159   : > { %897 = vmatpush.bf16.msra.mxu0 %v1285_v45  ;;  %1527 = vmatpush.bf16.msra.mxu1 %v1285_v45 }
 0x15a   : > { %1528 = vmatpush.bf16.msra.mxu2 %v1285_v45  ;;  %1529 = vmatpush.bf16.msra.mxu3 %v1285_v45 }
 0x15c   : > { %898 = vmatmul.bf16.vlgmr.msra.gmra.mxu0 %v814_v51  ;;  %908 = vmatmul.bf16.vlgmr.msra.gmra.mxu1 %v816_v52 }
 0x15d   : > { %918 = vmatmul.bf16.vlgmr.msra.gmra.mxu2 %v818_v55  ;;  %928 = vmatmul.bf16.vlgmr.msra.gmra.mxu3 %v820_v56 }
 0x16c   : > { %903 = vmatmul.bf16.gmra.mxu0 %v815_v29  ;;  %913 = vmatmul.bf16.gmra.mxu1 %v817_v30 }
 0x16d   : > { %923 = vmatmul.bf16.gmra.mxu2 %v819_v31  ;;  %933 = vmatmul.bf16.gmra.mxu3 %v821_v32 }
 0x1d9   : > { %v899_v33 = vpop.f32.mrf.mxu0  ;;  %v909_v34 = vpop.f32.mrf.mxu1 }
 0x1da   : > { %v900_v36 = vadd.f32 %v1603_v35, %v899_v33  ;;  %v910_v37 = vadd.f32 %v1603_v35, %v909_v34 }
 0x1dc   : > { %v939_v44 = vmax.f32 %v900_v36, 0.0  ;;  %v943_v45 = vmax.f32 %v910_v37, 0.0 }
 0x1e0   : > { %v919_v38 = vpop.f32.mrf.mxu2  ;;  %v929_v39 = vpop.f32.mrf.mxu3 }
 0x1e1   : > { %v901_v40 = vpop.f32.mrf.mxu0  ;;  %v911_v41 = vpop.f32.mrf.mxu1  ;;  %v920_v50 = vadd.f32 %v1603_v35, %v919_v38  ;;  %v930_v51 = vadd.f32 %v1603_v35, %v929_v39 }
 0x1e2   : > { %v902_v42 = vadd.f32 %v1603_v35, %v901_v40  ;;  %v912_v43 = vadd.f32 %v1603_v35, %v911_v41 }
 0x1e3   : > { %v947_v58 = vmax.f32 %v920_v50, 0.0  ;;  %v951_v59 = vmax.f32 %v930_v51, 0.0 }
 0x1e4   : > { %v940_v46 = vmax.f32 %v902_v42, 0.0  ;;  %v944_v47 = vmax.f32 %v912_v43, 0.0 }
 0x1e6   : > { %v1377_v48 = vpack.c.bf16 %v940_v46, %v939_v44  ;;  %v1387_v49 = vpack.c.bf16 %v944_v47, %v943_v45 }
 0x1e8   : > { %1378 = vst [vmem:[%s1979_s30] sm:$0xff] %v1377_v48   ;;  %v921_v52 = vpop.f32.mrf.mxu2  ;;  %v931_v53 = vpop.f32.mrf.mxu3 }
 0x1e9   : > { %1469 = vst [vmem:[%s1979_s30 + $0x10] sm:$0xff] %v1387_v49   ;;  %v922_v54 = vadd.f32 %v1603_v35, %v921_v52  ;;  %v932_v55 = vadd.f32 %v1603_v35, %v931_v53  ;;  %v904_v56 = vpop.f32.mrf.mxu0  ;;  %v914_v57 = vpop.f32.mrf.mxu1 }
 0x1ea   : > { %v905_v0 = vadd.f32 %v1603_v35, %v904_v56  ;;  %v915_v1 = vadd.f32 %v1603_v35, %v914_v57 }
 0x1eb   : > { %v948_v60 = vmax.f32 %v922_v54, 0.0  ;;  %v952_v61 = vmax.f32 %v932_v55, 0.0 }
 0x1ec   : > { %v941_v8 = vmax.f32 %v905_v0, 0.0  ;;  %v945_v9 = vmax.f32 %v915_v1, 0.0 }
 0x1ed   : > { %v1397_v62 = vpack.c.bf16 %v948_v60, %v947_v58  ;;  %v1407_v63 = vpack.c.bf16 %v952_v61, %v951_v59 }
 0x1ef   : > { %1471 = vst [vmem:[%s1979_s30 + $0x20] sm:$0xff] %v1397_v62  }
 0x1f0   : > { %1473 = vst [vmem:[%s1979_s30 + $0x30] sm:$0xff] %v1407_v63   ;;  %v924_v2 = vpop.f32.mrf.mxu2  ;;  %v934_v3 = vpop.f32.mrf.mxu3 }
 0x1f1   : > { %v906_v4 = vpop.f32.mrf.mxu0  ;;  %v916_v5 = vpop.f32.mrf.mxu1  ;;  %v925_v14 = vadd.f32 %v1603_v35, %v924_v2  ;;  %v935_v15 = vadd.f32 %v1603_v35, %v934_v3 }
 0x1f2   : > { %v907_v6 = vadd.f32 %v1603_v35, %v906_v4  ;;  %v917_v7 = vadd.f32 %v1603_v35, %v916_v5 }
 0x1f3   : > { %v949_v20 = vmax.f32 %v925_v14, 0.0  ;;  %v953_v21 = vmax.f32 %v935_v15, 0.0 }
 0x1f4   : > { %v942_v10 = vmax.f32 %v907_v6, 0.0  ;;  %v946_v11 = vmax.f32 %v917_v7, 0.0 }
 0x1f6   : > { %v1382_v12 = vpack.c.bf16 %v942_v10, %v941_v8  ;;  %v1392_v13 = vpack.c.bf16 %v946_v11, %v945_v9 }
 0x1f8   : > { %1468 = vst [vmem:[%s1979_s30 + $0x8] sm:$0xff] %v1382_v12   ;;  %v926_v16 = vpop.f32.mrf.mxu2  ;;  %v936_v17 = vpop.f32.mrf.mxu3 }
 0x1f9   : > { %1470 = vst [vmem:[%s1979_s30 + $0x18] sm:$0xff] %v1392_v13   ;;  %v927_v18 = vadd.f32 %v1603_v35, %v926_v16  ;;  %v937_v19 = vadd.f32 %v1603_v35, %v936_v17 }
 0x1fb   : > { %v950_v22 = vmax.f32 %v927_v18, 0.0  ;;  %v954_v23 = vmax.f32 %v937_v19, 0.0 }
 0x1fc   : > { %1008 = sbr.rel (%p1263_p11) target bundleno = 521 (0x209), region = 93 }
 0x1fd   : > { %v1402_v24 = vpack.c.bf16 %v950_v22, %v949_v20  ;;  %v1412_v25 = vpack.c.bf16 %v954_v23, %v953_v21 }
 0x1ff   : > { %1472 = vst [vmem:[%s1979_s30 + $0x28] sm:$0xff] %v1402_v24  }
 0x200   : > { %1474 = vst [vmem:[%s1979_s30 + $0x38] sm:$0xff] %v1412_v25  }
 0x201   : > { %1418 = vst [vmem:[%s1815_s27] sm:$0xff] %v1377_v48  }
 0x202   : > { %1475 = vst [vmem:[%s1815_s27 + $0x8] sm:$0xff] %v1382_v12  }
 0x203   : > { %1476 = vst [vmem:[%s1815_s27 + $0x10] sm:$0xff] %v1387_v49  }
 0x204   : > { %1477 = vst [vmem:[%s1815_s27 + $0x18] sm:$0xff] %v1392_v13  }
 0x205   : > { %1478 = vst [vmem:[%s1815_s27 + $0x20] sm:$0xff] %v1397_v62  }
 0x206   : > { %1479 = vst [vmem:[%s1815_s27 + $0x28] sm:$0xff] %v1402_v24  }
 0x207   : > { %1480 = vst [vmem:[%s1815_s27 + $0x30] sm:$0xff] %v1407_v63  }
 0x208   : > { %1481 = vst [vmem:[%s1815_s27 + $0x38] sm:$0xff] %v1412_v25  }
 0x209 PF: > { %s14_s23 = sadd.s32 1, %s1674_s23   ;;  %s2033_s15 = smov %s1646_s16 }
 0x20a   : > { %p11_p12 = scmp.ge.s32.totalorder %s14_s23, 18   ;;  %s2034_s16 = smov %s1767_s5 }
 0x20b   : > { %s2035_s17 = smov %s1662_s20  ;;  %s2036_s18 = smov %s1666_s21 }
 0x20c   : > { %s2037_s19 = smov %s1670_s22  ;;  %s2038_s20 = smov %s2042_s24 }
 0x20d   : > { %s2039_s21 = smov %s2046_s25  ;;  %s2040_s22 = smov %s2050_s26 }
 0x20e   :  { %13 = sbr.rel (!%p11_p12) target bundleno = 7 (0x7), region = 138 }

</bundles_post_ra>
